<compile_context>
chip_gen: v5e
topology: v5e:2x2
jax: 0.10.0
libtpu: 0.0.40
codegen_flags: <defaults>
</compile_context>

<pallas_src>
import functools

import jax
import jax.numpy as jnp
from jax.experimental import pallas as pl
from jax.experimental.pallas import tpu as pltpu


def make_qst_encoder_kernel(T, B, Bp, E, H, L, Fp):
    """Kernel body for fixed static sizes.

    Refs (in order):
      ids     SMEM (B, T)  int32      token ids
      tbl     VMEM (V, 1, E) f32      tanh(embedding) table
      w_ih0   VMEM (E, 4H) bf16       layer-0 input weights  [i|f|g|o]
      w_hh0   VMEM (H, 4H) bf16       layer-0 recurrent weights
      w_pk    VMEM (L-1, 2H, 4H) bf16 layers 1..L-1 packed [W_ih ; W_hh]   (L>1)
      b       VMEM (L, 1, 4H) f32     fused biases (b_ih + b_hh)
      fc_w    VMEM (2LH, Fp) bf16     FC weights, rows ordered [h_0|c_0|h_1|c_1|...]
      fc_b    VMEM (1, Fp) f32
      out     VMEM (Bp, Fp) f32       lane-dense output
      x0      VMEM (T*Bp, E) f32      scratch: gathered layer-0 input
    """

    def kernel(*refs):
        it = iter(refs)
        ids_ref = next(it)
        tbl_ref = next(it)
        w_ih0_ref = next(it)
        w_hh0_ref = next(it)
        w_pk_ref = next(it) if L > 1 else None
        b_ref = next(it)
        fcw_ref = next(it)
        fcb_ref = next(it)
        out_ref = next(it)
        x0_ref = next(it)

        # ---- In-kernel embedding gather (tanh pre-applied to the table). ----
        x0_ref[...] = jnp.zeros_like(x0_ref)          # padded batch rows stay 0
        for t in range(T):
            for b in range(B):
                idx = ids_ref[b, t]                   # scalar from SMEM
                x0_ref[pl.ds(t * Bp + b, 1), :] = tbl_ref[idx]   # (1, E) row

        # ---- Layer 0: hoisted, time-independent input projection. ----
        x0 = x0_ref[...].astype(jnp.bfloat16)                           # (T*Bp, E)
        xproj0 = jnp.dot(x0, w_ih0_ref[...],
                         preferred_element_type=jnp.float32) + b_ref[0]  # (T*Bp, 4H)

        def lstm_cell(gates, c):
            # Two full-vreg EUP passes instead of four quarter-vreg ones.
            sig = jax.nn.sigmoid(gates)
            tg = jnp.tanh(gates)
            i_g = sig[:, 0 * H:1 * H]
            f_g = sig[:, 1 * H:2 * H]
            o_g = sig[:, 3 * H:4 * H]
            g_g = tg[:, 2 * H:3 * H]
            c_new = f_g * c + i_g * g_g
            h_new = o_g * jnp.tanh(c_new)
            return h_new, c_new

        w_hh0 = w_hh0_ref[...]
        h = jnp.zeros((Bp, H), jnp.float32)
        c = jnp.zeros((Bp, H), jnp.float32)
        h_seq = []
        for t in range(T):
            gates = xproj0[t * Bp:(t + 1) * Bp, :] + jnp.dot(
                h.astype(jnp.bfloat16), w_hh0,
                preferred_element_type=jnp.float32)                      # (Bp, 4H)
            h, c = lstm_cell(gates, c)
            h_seq.append(h)
        parts = [h, c]

        # ---- Layers 1..L-1: per-step chaining (wavefront with layer below). ----
        for l in range(1, L):
            w_pk = w_pk_ref[l - 1]                                       # (2H, 4H)
            b_l = b_ref[l]                                               # (1, 4H)
            h = jnp.zeros((Bp, H), jnp.float32)
            c = jnp.zeros((Bp, H), jnp.float32)
            new_seq = []
            for t in range(T):
                lhs = jnp.concatenate([h_seq[t], h], axis=1).astype(jnp.bfloat16)
                gates = jnp.dot(lhs, w_pk,
                                preferred_element_type=jnp.float32) + b_l
                h, c = lstm_cell(gates, c)
                if l < L - 1:
                    new_seq.append(h)
            h_seq = new_seq
            parts += [h, c]

        # ---- FC epilogue: one lane-concat, one tanh, one full-contraction dot. ----
        feat = jnp.concatenate(parts, axis=1)                            # (Bp, 2LH)
        z = jnp.tanh(feat).astype(jnp.bfloat16)
        out_ref[...] = jnp.dot(z, fcw_ref[...],
                               preferred_element_type=jnp.float32) + fcb_ref[...]

    return kernel


def init_params(key, V, E, H, L, F):
    ks = jax.random.split(key, 7)
    s = 0.1
    params = {
        "embedding": jax.random.normal(ks[0], (V, E), jnp.float32) * s,
        # Fused gate weights: columns ordered [i | f | g | o].
        "w_ih0": jax.random.normal(ks[1], (E, 4 * H), jnp.float32) * s,
        "w_hh": jax.random.normal(ks[3], (L, H, 4 * H), jnp.float32) * s,
        "b": jax.random.normal(ks[4], (L, 1, 4 * H), jnp.float32) * s,   # b_ih + b_hh
        # FC weight split per part k (k=2l -> h_l rows, k=2l+1 -> c_l rows).
        "fc_w": jax.random.normal(ks[5], (2 * L, H, F), jnp.float32) * s,
        "fc_b": jax.random.normal(ks[6], (1, F), jnp.float32) * s,
    }
    if L > 1:
        params["w_ih_rest"] = jax.random.normal(ks[2], (L - 1, H, 4 * H),
                                                jnp.float32) * s
    return params


def prepack_params(params, *, hidden_size, num_layers, feature_size):
    """One-time host-side packing (outside the per-call path)."""
    H, L, F = hidden_size, num_layers, feature_size
    Fp = ((F + 127) // 128) * 128
    V, E = params["embedding"].shape
    packed = {
        # tanh is elementwise -> pre-apply to the table: tanh(E)[ids] == tanh(E[ids]).
        "tanh_tbl": jnp.tanh(params["embedding"]).reshape(V, 1, E).astype(jnp.float32),
        "w_ih0": params["w_ih0"].astype(jnp.bfloat16),
        "w_hh0": params["w_hh"][0].astype(jnp.bfloat16),
        "b": params["b"].astype(jnp.float32),
        "fc_w": jnp.pad(params["fc_w"].reshape(2 * L * H, F),
                        ((0, 0), (0, Fp - F))).astype(jnp.bfloat16),
        "fc_b": jnp.pad(params["fc_b"], ((0, 0), (0, Fp - F))).astype(jnp.float32),
    }
    if L > 1:
        # Per layer l>=1: rows [W_ih (H) ; W_hh (H)] -> one (2H,4H) MXU RHS per step.
        packed["w_pk"] = jnp.concatenate(
            [params["w_ih_rest"], params["w_hh"][1:]], axis=1).astype(jnp.bfloat16)
    return packed


@functools.partial(jax.jit,
                   static_argnames=("hidden_size", "num_layers", "feature_size"))
def qst_encoder_forward(question, packed, *, hidden_size, num_layers, feature_size):
    B, T = question.shape
    H, L, F = hidden_size, num_layers, feature_size
    E = packed["tanh_tbl"].shape[2]
    Fp = packed["fc_w"].shape[1]
    Bp = ((B + 7) // 8) * 8          # pad batch to full sublane width

    args = [question.astype(jnp.int32), packed["tanh_tbl"],
            packed["w_ih0"], packed["w_hh0"]]
    if L > 1:
        args.append(packed["w_pk"])
    args += [packed["b"], packed["fc_w"], packed["fc_b"]]

    vmem = pl.BlockSpec(memory_space=pltpu.MemorySpace.VMEM)
    smem = pl.BlockSpec(memory_space=pltpu.MemorySpace.SMEM)
    in_specs = [smem] + [vmem] * (len(args) - 1)

    kernel = make_qst_encoder_kernel(T, B, Bp, E, H, L, Fp)
    out = pl.pallas_call(
        kernel,
        out_shape=jax.ShapeDtypeStruct((Bp, Fp), jnp.float32),
        in_specs=in_specs,
        out_specs=vmem,
        scratch_shapes=[pltpu.VMEM((T * Bp, E), jnp.float32)],
    )(*args)
    return out[:B, :F]


def qst_encoder_reference(question, params, *, hidden_size, num_layers, feature_size):
    """Pure-JAX f32 reference (same math, no Pallas) for correctness checking."""
    B, T = question.shape
    H, L, F = hidden_size, num_layers, feature_size
    emb = jnp.take(params["embedding"], question, axis=0)                # (B, T, E)
    x = jnp.tanh(jnp.transpose(emb, (1, 0, 2)).astype(jnp.float32))      # (T, B, E)
    parts = []
    for l in range(L):
        w_ih = params["w_ih0"] if l == 0 else params["w_ih_rest"][l - 1]
        w_hh = params["w_hh"][l]
        b = params["b"][l]
        h = jnp.zeros((B, H), jnp.float32)
        c = jnp.zeros((B, H), jnp.float32)
        outs = []
        for t in range(T):
            gates = x[t] @ w_ih + h @ w_hh + b
            i_g = jax.nn.sigmoid(gates[:, :H])
            f_g = jax.nn.sigmoid(gates[:, H:2 * H])
            g_g = jnp.tanh(gates[:, 2 * H:3 * H])
            o_g = jax.nn.sigmoid(gates[:, 3 * H:])
            c = f_g * c + i_g * g_g
            h = o_g * jnp.tanh(c)
            outs.append(h)
        x = jnp.stack(outs, axis=0)
        parts += [h, c]
    feat = jnp.tanh(jnp.concatenate(parts, axis=1))                      # (B, 2LH)
    fcw = params["fc_w"].reshape(2 * L * H, F)
    return feat @ fcw + params["fc_b"]


if __name__ == "__main__":
    qst_vocab_size = 50
    qst_embed_size = 16
    hidden_size = 32       # 4H = 128: one full lane-width of fused gates
    num_layers = 2
    feature_size = 24
    batch, seq = 2, 8

    key = jax.random.PRNGKey(0)
    k_q, k_p = jax.random.split(key)
    question = jax.random.randint(k_q, (batch, seq), 0, qst_vocab_size,
                                  dtype=jnp.int32)
    params = init_params(k_p, qst_vocab_size, qst_embed_size, hidden_size,
                         num_layers, feature_size)

    # One-time prepack (gate fusion, bf16 cast, tanh'd table, FC pad) outside
    # the per-call path.
    packed = prepack_params(params, hidden_size=hidden_size,
                            num_layers=num_layers, feature_size=feature_size)
    packed = jax.tree_util.tree_map(jax.block_until_ready, packed)

    out = qst_encoder_forward(question, packed,
                              hidden_size=hidden_size,
                              num_layers=num_layers,
                              feature_size=feature_size)
    out = jax.block_until_ready(out)

    ref = qst_encoder_reference(question, params,
                                hidden_size=hidden_size,
                                num_layers=num_layers,
                                feature_size=feature_size)

    assert out.shape == (batch, feature_size)
    assert out.dtype == jnp.float32
    # bf16 MXU operands vs f32 reference -> looser (expected) tolerance.
    assert jnp.allclose(out, ref, atol=3e-2, rtol=3e-2), \
        float(jnp.max(jnp.abs(out - ref)))
    print("KERNEL_OK")
</pallas_src>

<mosaic_0001>
module attributes {stable_mosaic.version = 11 : i64} {
  func.func @kernel(%arg0: memref<2x8xi32, #tpu.memory_space<smem>>, %arg1: memref<50x1x16xf32, #tpu.memory_space<vmem>>, %arg2: memref<16x128xbf16, #tpu.memory_space<vmem>>, %arg3: memref<32x128xbf16, #tpu.memory_space<vmem>>, %arg4: memref<1x64x128xbf16, #tpu.memory_space<vmem>>, %arg5: memref<2x1x128xf32, #tpu.memory_space<vmem>>, %arg6: memref<128x128xbf16, #tpu.memory_space<vmem>>, %arg7: memref<1x128xf32, #tpu.memory_space<vmem>>, %arg8: memref<8x128xf32, #tpu.memory_space<vmem>>, %arg9: memref<64x16xf32, #tpu.memory_space<vmem>>) attributes {dimension_semantics = [], scalar_prefetch = 0 : i64, scratch_operands = 1 : i64, tpu.core_type = #tpu.core_type<tc>} {
    %cst = arith.constant 0.000000e+00 : f32
    %0 = vector.broadcast %cst : f32 to vector<64x16xf32>
    %c0 = arith.constant 0 : index
    %c0_0 = arith.constant 0 : index
    %1 = vector.load %arg9[%c0, %c0_0] : memref<64x16xf32, #tpu.memory_space<vmem>>, vector<64x16xf32>
    tpu.vector_store %arg9[%c0, %c0_0], %0 {strides = array<i32>} : memref<64x16xf32, #tpu.memory_space<vmem>>, vector<64x16xf32>,
    %c0_1 = arith.constant 0 : index
    %c0_2 = arith.constant 0 : index
    %2 = memref.load %arg0[%c0_1, %c0_2] : memref<2x8xi32, #tpu.memory_space<smem>>
    %3 = arith.index_cast %2 : i32 to index
    %c0_3 = arith.constant 0 : index
    %c0_4 = arith.constant 0 : index
    %4 = vector.load %arg1[%3, %c0_3, %c0_4] : memref<50x1x16xf32, #tpu.memory_space<vmem>>, vector<1x1x16xf32>
    %5 = vector.shape_cast %4 : vector<1x1x16xf32> to vector<1x16xf32>
    %c0_5 = arith.constant 0 : index
    %c0_6 = arith.constant 0 : index
    %6 = vector.load %arg9[%c0_5, %c0_6] : memref<64x16xf32, #tpu.memory_space<vmem>>, vector<1x16xf32>
    tpu.vector_store %arg9[%c0_5, %c0_6], %5 {strides = array<i32>} : memref<64x16xf32, #tpu.memory_space<vmem>>, vector<1x16xf32>,
    %c1 = arith.constant 1 : index
    %c0_7 = arith.constant 0 : index
    %7 = memref.load %arg0[%c1, %c0_7] : memref<2x8xi32, #tpu.memory_space<smem>>
    %8 = arith.index_cast %7 : i32 to index
    %c0_8 = arith.constant 0 : index
    %c0_9 = arith.constant 0 : index
    %9 = vector.load %arg1[%8, %c0_8, %c0_9] : memref<50x1x16xf32, #tpu.memory_space<vmem>>, vector<1x1x16xf32>
    %10 = vector.shape_cast %9 : vector<1x1x16xf32> to vector<1x16xf32>
    %c1_10 = arith.constant 1 : index
    %c0_11 = arith.constant 0 : index
    %11 = vector.load %arg9[%c1_10, %c0_11] : memref<64x16xf32, #tpu.memory_space<vmem>>, vector<1x16xf32>
    tpu.vector_store %arg9[%c1_10, %c0_11], %10 {strides = array<i32>} : memref<64x16xf32, #tpu.memory_space<vmem>>, vector<1x16xf32>,
    %c0_12 = arith.constant 0 : index
    %c1_13 = arith.constant 1 : index
    %12 = memref.load %arg0[%c0_12, %c1_13] : memref<2x8xi32, #tpu.memory_space<smem>>
    %13 = arith.index_cast %12 : i32 to index
    %c0_14 = arith.constant 0 : index
    %c0_15 = arith.constant 0 : index
    %14 = vector.load %arg1[%13, %c0_14, %c0_15] : memref<50x1x16xf32, #tpu.memory_space<vmem>>, vector<1x1x16xf32>
    %15 = vector.shape_cast %14 : vector<1x1x16xf32> to vector<1x16xf32>
    %c8 = arith.constant 8 : index
    %c0_16 = arith.constant 0 : index
    %16 = vector.load %arg9[%c8, %c0_16] : memref<64x16xf32, #tpu.memory_space<vmem>>, vector<1x16xf32>
    tpu.vector_store %arg9[%c8, %c0_16], %15 {strides = array<i32>} : memref<64x16xf32, #tpu.memory_space<vmem>>, vector<1x16xf32>,
    %c1_17 = arith.constant 1 : index
    %c1_18 = arith.constant 1 : index
    %17 = memref.load %arg0[%c1_17, %c1_18] : memref<2x8xi32, #tpu.memory_space<smem>>
    %18 = arith.index_cast %17 : i32 to index
    %c0_19 = arith.constant 0 : index
    %c0_20 = arith.constant 0 : index
    %19 = vector.load %arg1[%18, %c0_19, %c0_20] : memref<50x1x16xf32, #tpu.memory_space<vmem>>, vector<1x1x16xf32>
    %20 = vector.shape_cast %19 : vector<1x1x16xf32> to vector<1x16xf32>
    %c9 = arith.constant 9 : index
    %c0_21 = arith.constant 0 : index
    %21 = vector.load %arg9[%c9, %c0_21] : memref<64x16xf32, #tpu.memory_space<vmem>>, vector<1x16xf32>
    tpu.vector_store %arg9[%c9, %c0_21], %20 {strides = array<i32>} : memref<64x16xf32, #tpu.memory_space<vmem>>, vector<1x16xf32>,
    %c0_22 = arith.constant 0 : index
    %c2 = arith.constant 2 : index
    %22 = memref.load %arg0[%c0_22, %c2] : memref<2x8xi32, #tpu.memory_space<smem>>
    %23 = arith.index_cast %22 : i32 to index
    %c0_23 = arith.constant 0 : index
    %c0_24 = arith.constant 0 : index
    %24 = vector.load %arg1[%23, %c0_23, %c0_24] : memref<50x1x16xf32, #tpu.memory_space<vmem>>, vector<1x1x16xf32>
    %25 = vector.shape_cast %24 : vector<1x1x16xf32> to vector<1x16xf32>
    %c16 = arith.constant 16 : index
    %c0_25 = arith.constant 0 : index
    %26 = vector.load %arg9[%c16, %c0_25] : memref<64x16xf32, #tpu.memory_space<vmem>>, vector<1x16xf32>
    tpu.vector_store %arg9[%c16, %c0_25], %25 {strides = array<i32>} : memref<64x16xf32, #tpu.memory_space<vmem>>, vector<1x16xf32>,
    %c1_26 = arith.constant 1 : index
    %c2_27 = arith.constant 2 : index
    %27 = memref.load %arg0[%c1_26, %c2_27] : memref<2x8xi32, #tpu.memory_space<smem>>
    %28 = arith.index_cast %27 : i32 to index
    %c0_28 = arith.constant 0 : index
    %c0_29 = arith.constant 0 : index
    %29 = vector.load %arg1[%28, %c0_28, %c0_29] : memref<50x1x16xf32, #tpu.memory_space<vmem>>, vector<1x1x16xf32>
    %30 = vector.shape_cast %29 : vector<1x1x16xf32> to vector<1x16xf32>
    %c17 = arith.constant 17 : index
    %c0_30 = arith.constant 0 : index
    %31 = vector.load %arg9[%c17, %c0_30] : memref<64x16xf32, #tpu.memory_space<vmem>>, vector<1x16xf32>
    tpu.vector_store %arg9[%c17, %c0_30], %30 {strides = array<i32>} : memref<64x16xf32, #tpu.memory_space<vmem>>, vector<1x16xf32>,
    %c0_31 = arith.constant 0 : index
    %c3 = arith.constant 3 : index
    %32 = memref.load %arg0[%c0_31, %c3] : memref<2x8xi32, #tpu.memory_space<smem>>
    %33 = arith.index_cast %32 : i32 to index
    %c0_32 = arith.constant 0 : index
    %c0_33 = arith.constant 0 : index
    %34 = vector.load %arg1[%33, %c0_32, %c0_33] : memref<50x1x16xf32, #tpu.memory_space<vmem>>, vector<1x1x16xf32>
    %35 = vector.shape_cast %34 : vector<1x1x16xf32> to vector<1x16xf32>
    %c24 = arith.constant 24 : index
    %c0_34 = arith.constant 0 : index
    %36 = vector.load %arg9[%c24, %c0_34] : memref<64x16xf32, #tpu.memory_space<vmem>>, vector<1x16xf32>
    tpu.vector_store %arg9[%c24, %c0_34], %35 {strides = array<i32>} : memref<64x16xf32, #tpu.memory_space<vmem>>, vector<1x16xf32>,
    %c1_35 = arith.constant 1 : index
    %c3_36 = arith.constant 3 : index
    %37 = memref.load %arg0[%c1_35, %c3_36] : memref<2x8xi32, #tpu.memory_space<smem>>
    %38 = arith.index_cast %37 : i32 to index
    %c0_37 = arith.constant 0 : index
    %c0_38 = arith.constant 0 : index
    %39 = vector.load %arg1[%38, %c0_37, %c0_38] : memref<50x1x16xf32, #tpu.memory_space<vmem>>, vector<1x1x16xf32>
    %40 = vector.shape_cast %39 : vector<1x1x16xf32> to vector<1x16xf32>
    %c25 = arith.constant 25 : index
    %c0_39 = arith.constant 0 : index
    %41 = vector.load %arg9[%c25, %c0_39] : memref<64x16xf32, #tpu.memory_space<vmem>>, vector<1x16xf32>
    tpu.vector_store %arg9[%c25, %c0_39], %40 {strides = array<i32>} : memref<64x16xf32, #tpu.memory_space<vmem>>, vector<1x16xf32>,
    %c0_40 = arith.constant 0 : index
    %c4 = arith.constant 4 : index
    %42 = memref.load %arg0[%c0_40, %c4] : memref<2x8xi32, #tpu.memory_space<smem>>
    %43 = arith.index_cast %42 : i32 to index
    %c0_41 = arith.constant 0 : index
    %c0_42 = arith.constant 0 : index
    %44 = vector.load %arg1[%43, %c0_41, %c0_42] : memref<50x1x16xf32, #tpu.memory_space<vmem>>, vector<1x1x16xf32>
    %45 = vector.shape_cast %44 : vector<1x1x16xf32> to vector<1x16xf32>
    %c32 = arith.constant 32 : index
    %c0_43 = arith.constant 0 : index
    %46 = vector.load %arg9[%c32, %c0_43] : memref<64x16xf32, #tpu.memory_space<vmem>>, vector<1x16xf32>
    tpu.vector_store %arg9[%c32, %c0_43], %45 {strides = array<i32>} : memref<64x16xf32, #tpu.memory_space<vmem>>, vector<1x16xf32>,
    %c1_44 = arith.constant 1 : index
    %c4_45 = arith.constant 4 : index
    %47 = memref.load %arg0[%c1_44, %c4_45] : memref<2x8xi32, #tpu.memory_space<smem>>
    %48 = arith.index_cast %47 : i32 to index
    %c0_46 = arith.constant 0 : index
    %c0_47 = arith.constant 0 : index
    %49 = vector.load %arg1[%48, %c0_46, %c0_47] : memref<50x1x16xf32, #tpu.memory_space<vmem>>, vector<1x1x16xf32>
    %50 = vector.shape_cast %49 : vector<1x1x16xf32> to vector<1x16xf32>
    %c33 = arith.constant 33 : index
    %c0_48 = arith.constant 0 : index
    %51 = vector.load %arg9[%c33, %c0_48] : memref<64x16xf32, #tpu.memory_space<vmem>>, vector<1x16xf32>
    tpu.vector_store %arg9[%c33, %c0_48], %50 {strides = array<i32>} : memref<64x16xf32, #tpu.memory_space<vmem>>, vector<1x16xf32>,
    %c0_49 = arith.constant 0 : index
    %c5 = arith.constant 5 : index
    %52 = memref.load %arg0[%c0_49, %c5] : memref<2x8xi32, #tpu.memory_space<smem>>
    %53 = arith.index_cast %52 : i32 to index
    %c0_50 = arith.constant 0 : index
    %c0_51 = arith.constant 0 : index
    %54 = vector.load %arg1[%53, %c0_50, %c0_51] : memref<50x1x16xf32, #tpu.memory_space<vmem>>, vector<1x1x16xf32>
    %55 = vector.shape_cast %54 : vector<1x1x16xf32> to vector<1x16xf32>
    %c40 = arith.constant 40 : index
    %c0_52 = arith.constant 0 : index
    %56 = vector.load %arg9[%c40, %c0_52] : memref<64x16xf32, #tpu.memory_space<vmem>>, vector<1x16xf32>
    tpu.vector_store %arg9[%c40, %c0_52], %55 {strides = array<i32>} : memref<64x16xf32, #tpu.memory_space<vmem>>, vector<1x16xf32>,
    %c1_53 = arith.constant 1 : index
    %c5_54 = arith.constant 5 : index
    %57 = memref.load %arg0[%c1_53, %c5_54] : memref<2x8xi32, #tpu.memory_space<smem>>
    %58 = arith.index_cast %57 : i32 to index
    %c0_55 = arith.constant 0 : index
    %c0_56 = arith.constant 0 : index
    %59 = vector.load %arg1[%58, %c0_55, %c0_56] : memref<50x1x16xf32, #tpu.memory_space<vmem>>, vector<1x1x16xf32>
    %60 = vector.shape_cast %59 : vector<1x1x16xf32> to vector<1x16xf32>
    %c41 = arith.constant 41 : index
    %c0_57 = arith.constant 0 : index
    %61 = vector.load %arg9[%c41, %c0_57] : memref<64x16xf32, #tpu.memory_space<vmem>>, vector<1x16xf32>
    tpu.vector_store %arg9[%c41, %c0_57], %60 {strides = array<i32>} : memref<64x16xf32, #tpu.memory_space<vmem>>, vector<1x16xf32>,
    %c0_58 = arith.constant 0 : index
    %c6 = arith.constant 6 : index
    %62 = memref.load %arg0[%c0_58, %c6] : memref<2x8xi32, #tpu.memory_space<smem>>
    %63 = arith.index_cast %62 : i32 to index
    %c0_59 = arith.constant 0 : index
    %c0_60 = arith.constant 0 : index
    %64 = vector.load %arg1[%63, %c0_59, %c0_60] : memref<50x1x16xf32, #tpu.memory_space<vmem>>, vector<1x1x16xf32>
    %65 = vector.shape_cast %64 : vector<1x1x16xf32> to vector<1x16xf32>
    %c48 = arith.constant 48 : index
    %c0_61 = arith.constant 0 : index
    %66 = vector.load %arg9[%c48, %c0_61] : memref<64x16xf32, #tpu.memory_space<vmem>>, vector<1x16xf32>
    tpu.vector_store %arg9[%c48, %c0_61], %65 {strides = array<i32>} : memref<64x16xf32, #tpu.memory_space<vmem>>, vector<1x16xf32>,
    %c1_62 = arith.constant 1 : index
    %c6_63 = arith.constant 6 : index
    %67 = memref.load %arg0[%c1_62, %c6_63] : memref<2x8xi32, #tpu.memory_space<smem>>
    %68 = arith.index_cast %67 : i32 to index
    %c0_64 = arith.constant 0 : index
    %c0_65 = arith.constant 0 : index
    %69 = vector.load %arg1[%68, %c0_64, %c0_65] : memref<50x1x16xf32, #tpu.memory_space<vmem>>, vector<1x1x16xf32>
    %70 = vector.shape_cast %69 : vector<1x1x16xf32> to vector<1x16xf32>
    %c49 = arith.constant 49 : index
    %c0_66 = arith.constant 0 : index
    %71 = vector.load %arg9[%c49, %c0_66] : memref<64x16xf32, #tpu.memory_space<vmem>>, vector<1x16xf32>
    tpu.vector_store %arg9[%c49, %c0_66], %70 {strides = array<i32>} : memref<64x16xf32, #tpu.memory_space<vmem>>, vector<1x16xf32>,
    %c0_67 = arith.constant 0 : index
    %c7 = arith.constant 7 : index
    %72 = memref.load %arg0[%c0_67, %c7] : memref<2x8xi32, #tpu.memory_space<smem>>
    %73 = arith.index_cast %72 : i32 to index
    %c0_68 = arith.constant 0 : index
    %c0_69 = arith.constant 0 : index
    %74 = vector.load %arg1[%73, %c0_68, %c0_69] : memref<50x1x16xf32, #tpu.memory_space<vmem>>, vector<1x1x16xf32>
    %75 = vector.shape_cast %74 : vector<1x1x16xf32> to vector<1x16xf32>
    %c56 = arith.constant 56 : index
    %c0_70 = arith.constant 0 : index
    %76 = vector.load %arg9[%c56, %c0_70] : memref<64x16xf32, #tpu.memory_space<vmem>>, vector<1x16xf32>
    tpu.vector_store %arg9[%c56, %c0_70], %75 {strides = array<i32>} : memref<64x16xf32, #tpu.memory_space<vmem>>, vector<1x16xf32>,
    %c1_71 = arith.constant 1 : index
    %c7_72 = arith.constant 7 : index
    %77 = memref.load %arg0[%c1_71, %c7_72] : memref<2x8xi32, #tpu.memory_space<smem>>
    %78 = arith.index_cast %77 : i32 to index
    %c0_73 = arith.constant 0 : index
    %c0_74 = arith.constant 0 : index
    %79 = vector.load %arg1[%78, %c0_73, %c0_74] : memref<50x1x16xf32, #tpu.memory_space<vmem>>, vector<1x1x16xf32>
    %80 = vector.shape_cast %79 : vector<1x1x16xf32> to vector<1x16xf32>
    %c57 = arith.constant 57 : index
    %c0_75 = arith.constant 0 : index
    %81 = vector.load %arg9[%c57, %c0_75] : memref<64x16xf32, #tpu.memory_space<vmem>>, vector<1x16xf32>
    tpu.vector_store %arg9[%c57, %c0_75], %80 {strides = array<i32>} : memref<64x16xf32, #tpu.memory_space<vmem>>, vector<1x16xf32>,
    %c0_76 = arith.constant 0 : index
    %c0_77 = arith.constant 0 : index
    %82 = vector.load %arg9[%c0_76, %c0_77] : memref<64x16xf32, #tpu.memory_space<vmem>>, vector<64x16xf32>
    %83 = arith.truncf %82 : vector<64x16xf32> to vector<64x16xbf16>
    %c0_78 = arith.constant 0 : index
    %c0_79 = arith.constant 0 : index
    %84 = vector.load %arg2[%c0_78, %c0_79] : memref<16x128xbf16, #tpu.memory_space<vmem>>, vector<16x128xbf16>
    %cst_80 = arith.constant dense<0.000000e+00> : vector<64x128xf32>
    %85 = tpu.matmul %83, %84, %cst_80 {dimension_numbers = #tpu.dot_dimension_numbers<[1], [0], [0], [1], [0, 0, 1, 1], [], []>} : vector<64x16xbf16>, vector<16x128xbf16>, vector<64x128xf32> -> vector<64x128xf32>
    %c0_81 = arith.constant 0 : index
    %c0_82 = arith.constant 0 : index
    %c0_83 = arith.constant 0 : index
    %86 = vector.load %arg5[%c0_81, %c0_82, %c0_83] : memref<2x1x128xf32, #tpu.memory_space<vmem>>, vector<1x1x128xf32>
    %87 = vector.shape_cast %86 : vector<1x1x128xf32> to vector<1x128xf32>
    %88 = vector.broadcast %87 : vector<1x128xf32> to vector<64x128xf32>
    %89 = arith.addf %85, %88 : vector<64x128xf32>
    %c0_84 = arith.constant 0 : index
    %c0_85 = arith.constant 0 : index
    %90 = vector.load %arg3[%c0_84, %c0_85] : memref<32x128xbf16, #tpu.memory_space<vmem>>, vector<32x128xbf16>
    %cst_86 = arith.constant 0.000000e+00 : f32
    %91 = vector.broadcast %cst_86 : f32 to vector<8x32xf32>
    %cst_87 = arith.constant 0.000000e+00 : f32
    %92 = vector.broadcast %cst_87 : f32 to vector<8x32xf32>
    %93 = vector.extract_strided_slice %89 {offsets = [0, 0], sizes = [8, 128], strides = [1, 1]} : vector<64x128xf32> to vector<8x128xf32>
    %94 = arith.truncf %91 : vector<8x32xf32> to vector<8x32xbf16>
    %cst_88 = arith.constant dense<0.000000e+00> : vector<8x128xf32>
    %95 = tpu.matmul %94, %90, %cst_88 {dimension_numbers = #tpu.dot_dimension_numbers<[1], [0], [0], [1], [0, 0, 1, 1], [], []>} : vector<8x32xbf16>, vector<32x128xbf16>, vector<8x128xf32> -> vector<8x128xf32>
    %96 = arith.addf %93, %95 : vector<8x128xf32>
    %97 = arith.negf %96 : vector<8x128xf32>
    %98 = math.exp %97 : vector<8x128xf32>
    %cst_89 = arith.constant 1.000000e+00 : f32
    %99 = vector.broadcast %cst_89 : f32 to vector<8x128xf32>
    %100 = arith.addf %99, %98 : vector<8x128xf32>
    %101 = arith.divf %99, %100 : vector<8x128xf32>
    %102 = math.tanh %96 : vector<8x128xf32>
    %103 = vector.extract_strided_slice %101 {offsets = [0, 0], sizes = [8, 32], strides = [1, 1]} : vector<8x128xf32> to vector<8x32xf32>
    %104 = vector.extract_strided_slice %101 {offsets = [0, 32], sizes = [8, 32], strides = [1, 1]} : vector<8x128xf32> to vector<8x32xf32>
    %105 = vector.extract_strided_slice %101 {offsets = [0, 96], sizes = [8, 32], strides = [1, 1]} : vector<8x128xf32> to vector<8x32xf32>
    %106 = vector.extract_strided_slice %102 {offsets = [0, 64], sizes = [8, 32], strides = [1, 1]} : vector<8x128xf32> to vector<8x32xf32>
    %107 = arith.mulf %104, %92 : vector<8x32xf32>
    %108 = arith.mulf %103, %106 : vector<8x32xf32>
    %109 = arith.addf %107, %108 : vector<8x32xf32>
    %110 = math.tanh %109 : vector<8x32xf32>
    %111 = arith.mulf %105, %110 : vector<8x32xf32>
    %112 = vector.extract_strided_slice %89 {offsets = [8, 0], sizes = [8, 128], strides = [1, 1]} : vector<64x128xf32> to vector<8x128xf32>
    %113 = arith.truncf %111 : vector<8x32xf32> to vector<8x32xbf16>
    %cst_90 = arith.constant dense<0.000000e+00> : vector<8x128xf32>
    %114 = tpu.matmul %113, %90, %cst_90 {dimension_numbers = #tpu.dot_dimension_numbers<[1], [0], [0], [1], [0, 0, 1, 1], [], []>} : vector<8x32xbf16>, vector<32x128xbf16>, vector<8x128xf32> -> vector<8x128xf32>
    %115 = arith.addf %112, %114 : vector<8x128xf32>
    %116 = arith.negf %115 : vector<8x128xf32>
    %117 = math.exp %116 : vector<8x128xf32>
    %cst_91 = arith.constant 1.000000e+00 : f32
    %118 = vector.broadcast %cst_91 : f32 to vector<8x128xf32>
    %119 = arith.addf %118, %117 : vector<8x128xf32>
    %120 = arith.divf %118, %119 : vector<8x128xf32>
    %121 = math.tanh %115 : vector<8x128xf32>
    %122 = vector.extract_strided_slice %120 {offsets = [0, 0], sizes = [8, 32], strides = [1, 1]} : vector<8x128xf32> to vector<8x32xf32>
    %123 = vector.extract_strided_slice %120 {offsets = [0, 32], sizes = [8, 32], strides = [1, 1]} : vector<8x128xf32> to vector<8x32xf32>
    %124 = vector.extract_strided_slice %120 {offsets = [0, 96], sizes = [8, 32], strides = [1, 1]} : vector<8x128xf32> to vector<8x32xf32>
    %125 = vector.extract_strided_slice %121 {offsets = [0, 64], sizes = [8, 32], strides = [1, 1]} : vector<8x128xf32> to vector<8x32xf32>
    %126 = arith.mulf %123, %109 : vector<8x32xf32>
    %127 = arith.mulf %122, %125 : vector<8x32xf32>
    %128 = arith.addf %126, %127 : vector<8x32xf32>
    %129 = math.tanh %128 : vector<8x32xf32>
    %130 = arith.mulf %124, %129 : vector<8x32xf32>
    %131 = vector.extract_strided_slice %89 {offsets = [16, 0], sizes = [8, 128], strides = [1, 1]} : vector<64x128xf32> to vector<8x128xf32>
    %132 = arith.truncf %130 : vector<8x32xf32> to vector<8x32xbf16>
    %cst_92 = arith.constant dense<0.000000e+00> : vector<8x128xf32>
    %133 = tpu.matmul %132, %90, %cst_92 {dimension_numbers = #tpu.dot_dimension_numbers<[1], [0], [0], [1], [0, 0, 1, 1], [], []>} : vector<8x32xbf16>, vector<32x128xbf16>, vector<8x128xf32> -> vector<8x128xf32>
    %134 = arith.addf %131, %133 : vector<8x128xf32>
    %135 = arith.negf %134 : vector<8x128xf32>
    %136 = math.exp %135 : vector<8x128xf32>
    %cst_93 = arith.constant 1.000000e+00 : f32
    %137 = vector.broadcast %cst_93 : f32 to vector<8x128xf32>
    %138 = arith.addf %137, %136 : vector<8x128xf32>
    %139 = arith.divf %137, %138 : vector<8x128xf32>
    %140 = math.tanh %134 : vector<8x128xf32>
    %141 = vector.extract_strided_slice %139 {offsets = [0, 0], sizes = [8, 32], strides = [1, 1]} : vector<8x128xf32> to vector<8x32xf32>
    %142 = vector.extract_strided_slice %139 {offsets = [0, 32], sizes = [8, 32], strides = [1, 1]} : vector<8x128xf32> to vector<8x32xf32>
    %143 = vector.extract_strided_slice %139 {offsets = [0, 96], sizes = [8, 32], strides = [1, 1]} : vector<8x128xf32> to vector<8x32xf32>
    %144 = vector.extract_strided_slice %140 {offsets = [0, 64], sizes = [8, 32], strides = [1, 1]} : vector<8x128xf32> to vector<8x32xf32>
    %145 = arith.mulf %142, %128 : vector<8x32xf32>
    %146 = arith.mulf %141, %144 : vector<8x32xf32>
    %147 = arith.addf %145, %146 : vector<8x32xf32>
    %148 = math.tanh %147 : vector<8x32xf32>
    %149 = arith.mulf %143, %148 : vector<8x32xf32>
    %150 = vector.extract_strided_slice %89 {offsets = [24, 0], sizes = [8, 128], strides = [1, 1]} : vector<64x128xf32> to vector<8x128xf32>
    %151 = arith.truncf %149 : vector<8x32xf32> to vector<8x32xbf16>
    %cst_94 = arith.constant dense<0.000000e+00> : vector<8x128xf32>
    %152 = tpu.matmul %151, %90, %cst_94 {dimension_numbers = #tpu.dot_dimension_numbers<[1], [0], [0], [1], [0, 0, 1, 1], [], []>} : vector<8x32xbf16>, vector<32x128xbf16>, vector<8x128xf32> -> vector<8x128xf32>
    %153 = arith.addf %150, %152 : vector<8x128xf32>
    %154 = arith.negf %153 : vector<8x128xf32>
    %155 = math.exp %154 : vector<8x128xf32>
    %cst_95 = arith.constant 1.000000e+00 : f32
    %156 = vector.broadcast %cst_95 : f32 to vector<8x128xf32>
    %157 = arith.addf %156, %155 : vector<8x128xf32>
    %158 = arith.divf %156, %157 : vector<8x128xf32>
    %159 = math.tanh %153 : vector<8x128xf32>
    %160 = vector.extract_strided_slice %158 {offsets = [0, 0], sizes = [8, 32], strides = [1, 1]} : vector<8x128xf32> to vector<8x32xf32>
    %161 = vector.extract_strided_slice %158 {offsets = [0, 32], sizes = [8, 32], strides = [1, 1]} : vector<8x128xf32> to vector<8x32xf32>
    %162 = vector.extract_strided_slice %158 {offsets = [0, 96], sizes = [8, 32], strides = [1, 1]} : vector<8x128xf32> to vector<8x32xf32>
    %163 = vector.extract_strided_slice %159 {offsets = [0, 64], sizes = [8, 32], strides = [1, 1]} : vector<8x128xf32> to vector<8x32xf32>
    %164 = arith.mulf %161, %147 : vector<8x32xf32>
    %165 = arith.mulf %160, %163 : vector<8x32xf32>
    %166 = arith.addf %164, %165 : vector<8x32xf32>
    %167 = math.tanh %166 : vector<8x32xf32>
    %168 = arith.mulf %162, %167 : vector<8x32xf32>
    %169 = vector.extract_strided_slice %89 {offsets = [32, 0], sizes = [8, 128], strides = [1, 1]} : vector<64x128xf32> to vector<8x128xf32>
    %170 = arith.truncf %168 : vector<8x32xf32> to vector<8x32xbf16>
    %cst_96 = arith.constant dense<0.000000e+00> : vector<8x128xf32>
    %171 = tpu.matmul %170, %90, %cst_96 {dimension_numbers = #tpu.dot_dimension_numbers<[1], [0], [0], [1], [0, 0, 1, 1], [], []>} : vector<8x32xbf16>, vector<32x128xbf16>, vector<8x128xf32> -> vector<8x128xf32>
    %172 = arith.addf %169, %171 : vector<8x128xf32>
    %173 = arith.negf %172 : vector<8x128xf32>
    %174 = math.exp %173 : vector<8x128xf32>
    %cst_97 = arith.constant 1.000000e+00 : f32
    %175 = vector.broadcast %cst_97 : f32 to vector<8x128xf32>
    %176 = arith.addf %175, %174 : vector<8x128xf32>
    %177 = arith.divf %175, %176 : vector<8x128xf32>
    %178 = math.tanh %172 : vector<8x128xf32>
    %179 = vector.extract_strided_slice %177 {offsets = [0, 0], sizes = [8, 32], strides = [1, 1]} : vector<8x128xf32> to vector<8x32xf32>
    %180 = vector.extract_strided_slice %177 {offsets = [0, 32], sizes = [8, 32], strides = [1, 1]} : vector<8x128xf32> to vector<8x32xf32>
    %181 = vector.extract_strided_slice %177 {offsets = [0, 96], sizes = [8, 32], strides = [1, 1]} : vector<8x128xf32> to vector<8x32xf32>
    %182 = vector.extract_strided_slice %178 {offsets = [0, 64], sizes = [8, 32], strides = [1, 1]} : vector<8x128xf32> to vector<8x32xf32>
    %183 = arith.mulf %180, %166 : vector<8x32xf32>
    %184 = arith.mulf %179, %182 : vector<8x32xf32>
    %185 = arith.addf %183, %184 : vector<8x32xf32>
    %186 = math.tanh %185 : vector<8x32xf32>
    %187 = arith.mulf %181, %186 : vector<8x32xf32>
    %188 = vector.extract_strided_slice %89 {offsets = [40, 0], sizes = [8, 128], strides = [1, 1]} : vector<64x128xf32> to vector<8x128xf32>
    %189 = arith.truncf %187 : vector<8x32xf32> to vector<8x32xbf16>
    %cst_98 = arith.constant dense<0.000000e+00> : vector<8x128xf32>
    %190 = tpu.matmul %189, %90, %cst_98 {dimension_numbers = #tpu.dot_dimension_numbers<[1], [0], [0], [1], [0, 0, 1, 1], [], []>} : vector<8x32xbf16>, vector<32x128xbf16>, vector<8x128xf32> -> vector<8x128xf32>
    %191 = arith.addf %188, %190 : vector<8x128xf32>
    %192 = arith.negf %191 : vector<8x128xf32>
    %193 = math.exp %192 : vector<8x128xf32>
    %cst_99 = arith.constant 1.000000e+00 : f32
    %194 = vector.broadcast %cst_99 : f32 to vector<8x128xf32>
    %195 = arith.addf %194, %193 : vector<8x128xf32>
    %196 = arith.divf %194, %195 : vector<8x128xf32>
    %197 = math.tanh %191 : vector<8x128xf32>
    %198 = vector.extract_strided_slice %196 {offsets = [0, 0], sizes = [8, 32], strides = [1, 1]} : vector<8x128xf32> to vector<8x32xf32>
    %199 = vector.extract_strided_slice %196 {offsets = [0, 32], sizes = [8, 32], strides = [1, 1]} : vector<8x128xf32> to vector<8x32xf32>
    %200 = vector.extract_strided_slice %196 {offsets = [0, 96], sizes = [8, 32], strides = [1, 1]} : vector<8x128xf32> to vector<8x32xf32>
    %201 = vector.extract_strided_slice %197 {offsets = [0, 64], sizes = [8, 32], strides = [1, 1]} : vector<8x128xf32> to vector<8x32xf32>
    %202 = arith.mulf %199, %185 : vector<8x32xf32>
    %203 = arith.mulf %198, %201 : vector<8x32xf32>
    %204 = arith.addf %202, %203 : vector<8x32xf32>
    %205 = math.tanh %204 : vector<8x32xf32>
    %206 = arith.mulf %200, %205 : vector<8x32xf32>
    %207 = vector.extract_strided_slice %89 {offsets = [48, 0], sizes = [8, 128], strides = [1, 1]} : vector<64x128xf32> to vector<8x128xf32>
    %208 = arith.truncf %206 : vector<8x32xf32> to vector<8x32xbf16>
    %cst_100 = arith.constant dense<0.000000e+00> : vector<8x128xf32>
    %209 = tpu.matmul %208, %90, %cst_100 {dimension_numbers = #tpu.dot_dimension_numbers<[1], [0], [0], [1], [0, 0, 1, 1], [], []>} : vector<8x32xbf16>, vector<32x128xbf16>, vector<8x128xf32> -> vector<8x128xf32>
    %210 = arith.addf %207, %209 : vector<8x128xf32>
    %211 = arith.negf %210 : vector<8x128xf32>
    %212 = math.exp %211 : vector<8x128xf32>
    %cst_101 = arith.constant 1.000000e+00 : f32
    %213 = vector.broadcast %cst_101 : f32 to vector<8x128xf32>
    %214 = arith.addf %213, %212 : vector<8x128xf32>
    %215 = arith.divf %213, %214 : vector<8x128xf32>
    %216 = math.tanh %210 : vector<8x128xf32>
    %217 = vector.extract_strided_slice %215 {offsets = [0, 0], sizes = [8, 32], strides = [1, 1]} : vector<8x128xf32> to vector<8x32xf32>
    %218 = vector.extract_strided_slice %215 {offsets = [0, 32], sizes = [8, 32], strides = [1, 1]} : vector<8x128xf32> to vector<8x32xf32>
    %219 = vector.extract_strided_slice %215 {offsets = [0, 96], sizes = [8, 32], strides = [1, 1]} : vector<8x128xf32> to vector<8x32xf32>
    %220 = vector.extract_strided_slice %216 {offsets = [0, 64], sizes = [8, 32], strides = [1, 1]} : vector<8x128xf32> to vector<8x32xf32>
    %221 = arith.mulf %218, %204 : vector<8x32xf32>
    %222 = arith.mulf %217, %220 : vector<8x32xf32>
    %223 = arith.addf %221, %222 : vector<8x32xf32>
    %224 = math.tanh %223 : vector<8x32xf32>
    %225 = arith.mulf %219, %224 : vector<8x32xf32>
    %226 = vector.extract_strided_slice %89 {offsets = [56, 0], sizes = [8, 128], strides = [1, 1]} : vector<64x128xf32> to vector<8x128xf32>
    %227 = arith.truncf %225 : vector<8x32xf32> to vector<8x32xbf16>
    %cst_102 = arith.constant dense<0.000000e+00> : vector<8x128xf32>
    %228 = tpu.matmul %227, %90, %cst_102 {dimension_numbers = #tpu.dot_dimension_numbers<[1], [0], [0], [1], [0, 0, 1, 1], [], []>} : vector<8x32xbf16>, vector<32x128xbf16>, vector<8x128xf32> -> vector<8x128xf32>
    %229 = arith.addf %226, %228 : vector<8x128xf32>
    %230 = arith.negf %229 : vector<8x128xf32>
    %231 = math.exp %230 : vector<8x128xf32>
    %cst_103 = arith.constant 1.000000e+00 : f32
    %232 = vector.broadcast %cst_103 : f32 to vector<8x128xf32>
    %233 = arith.addf %232, %231 : vector<8x128xf32>
    %234 = arith.divf %232, %233 : vector<8x128xf32>
    %235 = math.tanh %229 : vector<8x128xf32>
    %236 = vector.extract_strided_slice %234 {offsets = [0, 0], sizes = [8, 32], strides = [1, 1]} : vector<8x128xf32> to vector<8x32xf32>
    %237 = vector.extract_strided_slice %234 {offsets = [0, 32], sizes = [8, 32], strides = [1, 1]} : vector<8x128xf32> to vector<8x32xf32>
    %238 = vector.extract_strided_slice %234 {offsets = [0, 96], sizes = [8, 32], strides = [1, 1]} : vector<8x128xf32> to vector<8x32xf32>
    %239 = vector.extract_strided_slice %235 {offsets = [0, 64], sizes = [8, 32], strides = [1, 1]} : vector<8x128xf32> to vector<8x32xf32>
    %240 = arith.mulf %237, %223 : vector<8x32xf32>
    %241 = arith.mulf %236, %239 : vector<8x32xf32>
    %242 = arith.addf %240, %241 : vector<8x32xf32>
    %243 = math.tanh %242 : vector<8x32xf32>
    %244 = arith.mulf %238, %243 : vector<8x32xf32>
    %c0_104 = arith.constant 0 : index
    %c0_105 = arith.constant 0 : index
    %c0_106 = arith.constant 0 : index
    %245 = vector.load %arg4[%c0_104, %c0_105, %c0_106] : memref<1x64x128xbf16, #tpu.memory_space<vmem>>, vector<1x64x128xbf16>
    %246 = vector.shape_cast %245 : vector<1x64x128xbf16> to vector<64x128xbf16>
    %c1_107 = arith.constant 1 : index
    %c0_108 = arith.constant 0 : index
    %c0_109 = arith.constant 0 : index
    %247 = vector.load %arg5[%c1_107, %c0_108, %c0_109] : memref<2x1x128xf32, #tpu.memory_space<vmem>>, vector<1x1x128xf32>
    %248 = vector.shape_cast %247 : vector<1x1x128xf32> to vector<1x128xf32>
    %cst_110 = arith.constant 0.000000e+00 : f32
    %249 = vector.broadcast %cst_110 : f32 to vector<8x32xf32>
    %cst_111 = arith.constant 0.000000e+00 : f32
    %250 = vector.broadcast %cst_111 : f32 to vector<8x32xf32>
    %251 = tpu.concatenate %111, %249 in 1 : vector<8x32xf32>, vector<8x32xf32> -> vector<8x64xf32>
    %252 = arith.truncf %251 : vector<8x64xf32> to vector<8x64xbf16>
    %cst_112 = arith.constant dense<0.000000e+00> : vector<8x128xf32>
    %253 = tpu.matmul %252, %246, %cst_112 {dimension_numbers = #tpu.dot_dimension_numbers<[1], [0], [0], [1], [0, 0, 1, 1], [], []>} : vector<8x64xbf16>, vector<64x128xbf16>, vector<8x128xf32> -> vector<8x128xf32>
    %254 = vector.broadcast %248 : vector<1x128xf32> to vector<8x128xf32>
    %255 = arith.addf %253, %254 : vector<8x128xf32>
    %256 = arith.negf %255 : vector<8x128xf32>
    %257 = math.exp %256 : vector<8x128xf32>
    %cst_113 = arith.constant 1.000000e+00 : f32
    %258 = vector.broadcast %cst_113 : f32 to vector<8x128xf32>
    %259 = arith.addf %258, %257 : vector<8x128xf32>
    %260 = arith.divf %258, %259 : vector<8x128xf32>
    %261 = math.tanh %255 : vector<8x128xf32>
    %262 = vector.extract_strided_slice %260 {offsets = [0, 0], sizes = [8, 32], strides = [1, 1]} : vector<8x128xf32> to vector<8x32xf32>
    %263 = vector.extract_strided_slice %260 {offsets = [0, 32], sizes = [8, 32], strides = [1, 1]} : vector<8x128xf32> to vector<8x32xf32>
    %264 = vector.extract_strided_slice %260 {offsets = [0, 96], sizes = [8, 32], strides = [1, 1]} : vector<8x128xf32> to vector<8x32xf32>
    %265 = vector.extract_strided_slice %261 {offsets = [0, 64], sizes = [8, 32], strides = [1, 1]} : vector<8x128xf32> to vector<8x32xf32>
    %266 = arith.mulf %263, %250 : vector<8x32xf32>
    %267 = arith.mulf %262, %265 : vector<8x32xf32>
    %268 = arith.addf %266, %267 : vector<8x32xf32>
    %269 = math.tanh %268 : vector<8x32xf32>
    %270 = arith.mulf %264, %269 : vector<8x32xf32>
    %271 = tpu.concatenate %130, %270 in 1 : vector<8x32xf32>, vector<8x32xf32> -> vector<8x64xf32>
    %272 = arith.truncf %271 : vector<8x64xf32> to vector<8x64xbf16>
    %cst_114 = arith.constant dense<0.000000e+00> : vector<8x128xf32>
    %273 = tpu.matmul %272, %246, %cst_114 {dimension_numbers = #tpu.dot_dimension_numbers<[1], [0], [0], [1], [0, 0, 1, 1], [], []>} : vector<8x64xbf16>, vector<64x128xbf16>, vector<8x128xf32> -> vector<8x128xf32>
    %274 = vector.broadcast %248 : vector<1x128xf32> to vector<8x128xf32>
    %275 = arith.addf %273, %274 : vector<8x128xf32>
    %276 = arith.negf %275 : vector<8x128xf32>
    %277 = math.exp %276 : vector<8x128xf32>
    %cst_115 = arith.constant 1.000000e+00 : f32
    %278 = vector.broadcast %cst_115 : f32 to vector<8x128xf32>
    %279 = arith.addf %278, %277 : vector<8x128xf32>
    %280 = arith.divf %278, %279 : vector<8x128xf32>
    %281 = math.tanh %275 : vector<8x128xf32>
    %282 = vector.extract_strided_slice %280 {offsets = [0, 0], sizes = [8, 32], strides = [1, 1]} : vector<8x128xf32> to vector<8x32xf32>
    %283 = vector.extract_strided_slice %280 {offsets = [0, 32], sizes = [8, 32], strides = [1, 1]} : vector<8x128xf32> to vector<8x32xf32>
    %284 = vector.extract_strided_slice %280 {offsets = [0, 96], sizes = [8, 32], strides = [1, 1]} : vector<8x128xf32> to vector<8x32xf32>
    %285 = vector.extract_strided_slice %281 {offsets = [0, 64], sizes = [8, 32], strides = [1, 1]} : vector<8x128xf32> to vector<8x32xf32>
    %286 = arith.mulf %283, %268 : vector<8x32xf32>
    %287 = arith.mulf %282, %285 : vector<8x32xf32>
    %288 = arith.addf %286, %287 : vector<8x32xf32>
    %289 = math.tanh %288 : vector<8x32xf32>
    %290 = arith.mulf %284, %289 : vector<8x32xf32>
    %291 = tpu.concatenate %149, %290 in 1 : vector<8x32xf32>, vector<8x32xf32> -> vector<8x64xf32>
    %292 = arith.truncf %291 : vector<8x64xf32> to vector<8x64xbf16>
    %cst_116 = arith.constant dense<0.000000e+00> : vector<8x128xf32>
    %293 = tpu.matmul %292, %246, %cst_116 {dimension_numbers = #tpu.dot_dimension_numbers<[1], [0], [0], [1], [0, 0, 1, 1], [], []>} : vector<8x64xbf16>, vector<64x128xbf16>, vector<8x128xf32> -> vector<8x128xf32>
    %294 = vector.broadcast %248 : vector<1x128xf32> to vector<8x128xf32>
    %295 = arith.addf %293, %294 : vector<8x128xf32>
    %296 = arith.negf %295 : vector<8x128xf32>
    %297 = math.exp %296 : vector<8x128xf32>
    %cst_117 = arith.constant 1.000000e+00 : f32
    %298 = vector.broadcast %cst_117 : f32 to vector<8x128xf32>
    %299 = arith.addf %298, %297 : vector<8x128xf32>
    %300 = arith.divf %298, %299 : vector<8x128xf32>
    %301 = math.tanh %295 : vector<8x128xf32>
    %302 = vector.extract_strided_slice %300 {offsets = [0, 0], sizes = [8, 32], strides = [1, 1]} : vector<8x128xf32> to vector<8x32xf32>
    %303 = vector.extract_strided_slice %300 {offsets = [0, 32], sizes = [8, 32], strides = [1, 1]} : vector<8x128xf32> to vector<8x32xf32>
    %304 = vector.extract_strided_slice %300 {offsets = [0, 96], sizes = [8, 32], strides = [1, 1]} : vector<8x128xf32> to vector<8x32xf32>
    %305 = vector.extract_strided_slice %301 {offsets = [0, 64], sizes = [8, 32], strides = [1, 1]} : vector<8x128xf32> to vector<8x32xf32>
    %306 = arith.mulf %303, %288 : vector<8x32xf32>
    %307 = arith.mulf %302, %305 : vector<8x32xf32>
    %308 = arith.addf %306, %307 : vector<8x32xf32>
    %309 = math.tanh %308 : vector<8x32xf32>
    %310 = arith.mulf %304, %309 : vector<8x32xf32>
    %311 = tpu.concatenate %168, %310 in 1 : vector<8x32xf32>, vector<8x32xf32> -> vector<8x64xf32>
    %312 = arith.truncf %311 : vector<8x64xf32> to vector<8x64xbf16>
    %cst_118 = arith.constant dense<0.000000e+00> : vector<8x128xf32>
    %313 = tpu.matmul %312, %246, %cst_118 {dimension_numbers = #tpu.dot_dimension_numbers<[1], [0], [0], [1], [0, 0, 1, 1], [], []>} : vector<8x64xbf16>, vector<64x128xbf16>, vector<8x128xf32> -> vector<8x128xf32>
    %314 = vector.broadcast %248 : vector<1x128xf32> to vector<8x128xf32>
    %315 = arith.addf %313, %314 : vector<8x128xf32>
    %316 = arith.negf %315 : vector<8x128xf32>
    %317 = math.exp %316 : vector<8x128xf32>
    %cst_119 = arith.constant 1.000000e+00 : f32
    %318 = vector.broadcast %cst_119 : f32 to vector<8x128xf32>
    %319 = arith.addf %318, %317 : vector<8x128xf32>
    %320 = arith.divf %318, %319 : vector<8x128xf32>
    %321 = math.tanh %315 : vector<8x128xf32>
    %322 = vector.extract_strided_slice %320 {offsets = [0, 0], sizes = [8, 32], strides = [1, 1]} : vector<8x128xf32> to vector<8x32xf32>
    %323 = vector.extract_strided_slice %320 {offsets = [0, 32], sizes = [8, 32], strides = [1, 1]} : vector<8x128xf32> to vector<8x32xf32>
    %324 = vector.extract_strided_slice %320 {offsets = [0, 96], sizes = [8, 32], strides = [1, 1]} : vector<8x128xf32> to vector<8x32xf32>
    %325 = vector.extract_strided_slice %321 {offsets = [0, 64], sizes = [8, 32], strides = [1, 1]} : vector<8x128xf32> to vector<8x32xf32>
    %326 = arith.mulf %323, %308 : vector<8x32xf32>
    %327 = arith.mulf %322, %325 : vector<8x32xf32>
    %328 = arith.addf %326, %327 : vector<8x32xf32>
    %329 = math.tanh %328 : vector<8x32xf32>
    %330 = arith.mulf %324, %329 : vector<8x32xf32>
    %331 = tpu.concatenate %187, %330 in 1 : vector<8x32xf32>, vector<8x32xf32> -> vector<8x64xf32>
    %332 = arith.truncf %331 : vector<8x64xf32> to vector<8x64xbf16>
    %cst_120 = arith.constant dense<0.000000e+00> : vector<8x128xf32>
    %333 = tpu.matmul %332, %246, %cst_120 {dimension_numbers = #tpu.dot_dimension_numbers<[1], [0], [0], [1], [0, 0, 1, 1], [], []>} : vector<8x64xbf16>, vector<64x128xbf16>, vector<8x128xf32> -> vector<8x128xf32>
    %334 = vector.broadcast %248 : vector<1x128xf32> to vector<8x128xf32>
    %335 = arith.addf %333, %334 : vector<8x128xf32>
    %336 = arith.negf %335 : vector<8x128xf32>
    %337 = math.exp %336 : vector<8x128xf32>
    %cst_121 = arith.constant 1.000000e+00 : f32
    %338 = vector.broadcast %cst_121 : f32 to vector<8x128xf32>
    %339 = arith.addf %338, %337 : vector<8x128xf32>
    %340 = arith.divf %338, %339 : vector<8x128xf32>
    %341 = math.tanh %335 : vector<8x128xf32>
    %342 = vector.extract_strided_slice %340 {offsets = [0, 0], sizes = [8, 32], strides = [1, 1]} : vector<8x128xf32> to vector<8x32xf32>
    %343 = vector.extract_strided_slice %340 {offsets = [0, 32], sizes = [8, 32], strides = [1, 1]} : vector<8x128xf32> to vector<8x32xf32>
    %344 = vector.extract_strided_slice %340 {offsets = [0, 96], sizes = [8, 32], strides = [1, 1]} : vector<8x128xf32> to vector<8x32xf32>
    %345 = vector.extract_strided_slice %341 {offsets = [0, 64], sizes = [8, 32], strides = [1, 1]} : vector<8x128xf32> to vector<8x32xf32>
    %346 = arith.mulf %343, %328 : vector<8x32xf32>
    %347 = arith.mulf %342, %345 : vector<8x32xf32>
    %348 = arith.addf %346, %347 : vector<8x32xf32>
    %349 = math.tanh %348 : vector<8x32xf32>
    %350 = arith.mulf %344, %349 : vector<8x32xf32>
    %351 = tpu.concatenate %206, %350 in 1 : vector<8x32xf32>, vector<8x32xf32> -> vector<8x64xf32>
    %352 = arith.truncf %351 : vector<8x64xf32> to vector<8x64xbf16>
    %cst_122 = arith.constant dense<0.000000e+00> : vector<8x128xf32>
    %353 = tpu.matmul %352, %246, %cst_122 {dimension_numbers = #tpu.dot_dimension_numbers<[1], [0], [0], [1], [0, 0, 1, 1], [], []>} : vector<8x64xbf16>, vector<64x128xbf16>, vector<8x128xf32> -> vector<8x128xf32>
    %354 = vector.broadcast %248 : vector<1x128xf32> to vector<8x128xf32>
    %355 = arith.addf %353, %354 : vector<8x128xf32>
    %356 = arith.negf %355 : vector<8x128xf32>
    %357 = math.exp %356 : vector<8x128xf32>
    %cst_123 = arith.constant 1.000000e+00 : f32
    %358 = vector.broadcast %cst_123 : f32 to vector<8x128xf32>
    %359 = arith.addf %358, %357 : vector<8x128xf32>
    %360 = arith.divf %358, %359 : vector<8x128xf32>
    %361 = math.tanh %355 : vector<8x128xf32>
    %362 = vector.extract_strided_slice %360 {offsets = [0, 0], sizes = [8, 32], strides = [1, 1]} : vector<8x128xf32> to vector<8x32xf32>
    %363 = vector.extract_strided_slice %360 {offsets = [0, 32], sizes = [8, 32], strides = [1, 1]} : vector<8x128xf32> to vector<8x32xf32>
    %364 = vector.extract_strided_slice %360 {offsets = [0, 96], sizes = [8, 32], strides = [1, 1]} : vector<8x128xf32> to vector<8x32xf32>
    %365 = vector.extract_strided_slice %361 {offsets = [0, 64], sizes = [8, 32], strides = [1, 1]} : vector<8x128xf32> to vector<8x32xf32>
    %366 = arith.mulf %363, %348 : vector<8x32xf32>
    %367 = arith.mulf %362, %365 : vector<8x32xf32>
    %368 = arith.addf %366, %367 : vector<8x32xf32>
    %369 = math.tanh %368 : vector<8x32xf32>
    %370 = arith.mulf %364, %369 : vector<8x32xf32>
    %371 = tpu.concatenate %225, %370 in 1 : vector<8x32xf32>, vector<8x32xf32> -> vector<8x64xf32>
    %372 = arith.truncf %371 : vector<8x64xf32> to vector<8x64xbf16>
    %cst_124 = arith.constant dense<0.000000e+00> : vector<8x128xf32>
    %373 = tpu.matmul %372, %246, %cst_124 {dimension_numbers = #tpu.dot_dimension_numbers<[1], [0], [0], [1], [0, 0, 1, 1], [], []>} : vector<8x64xbf16>, vector<64x128xbf16>, vector<8x128xf32> -> vector<8x128xf32>
    %374 = vector.broadcast %248 : vector<1x128xf32> to vector<8x128xf32>
    %375 = arith.addf %373, %374 : vector<8x128xf32>
    %376 = arith.negf %375 : vector<8x128xf32>
    %377 = math.exp %376 : vector<8x128xf32>
    %cst_125 = arith.constant 1.000000e+00 : f32
    %378 = vector.broadcast %cst_125 : f32 to vector<8x128xf32>
    %379 = arith.addf %378, %377 : vector<8x128xf32>
    %380 = arith.divf %378, %379 : vector<8x128xf32>
    %381 = math.tanh %375 : vector<8x128xf32>
    %382 = vector.extract_strided_slice %380 {offsets = [0, 0], sizes = [8, 32], strides = [1, 1]} : vector<8x128xf32> to vector<8x32xf32>
    %383 = vector.extract_strided_slice %380 {offsets = [0, 32], sizes = [8, 32], strides = [1, 1]} : vector<8x128xf32> to vector<8x32xf32>
    %384 = vector.extract_strided_slice %380 {offsets = [0, 96], sizes = [8, 32], strides = [1, 1]} : vector<8x128xf32> to vector<8x32xf32>
    %385 = vector.extract_strided_slice %381 {offsets = [0, 64], sizes = [8, 32], strides = [1, 1]} : vector<8x128xf32> to vector<8x32xf32>
    %386 = arith.mulf %383, %368 : vector<8x32xf32>
    %387 = arith.mulf %382, %385 : vector<8x32xf32>
    %388 = arith.addf %386, %387 : vector<8x32xf32>
    %389 = math.tanh %388 : vector<8x32xf32>
    %390 = arith.mulf %384, %389 : vector<8x32xf32>
    %391 = tpu.concatenate %244, %390 in 1 : vector<8x32xf32>, vector<8x32xf32> -> vector<8x64xf32>
    %392 = arith.truncf %391 : vector<8x64xf32> to vector<8x64xbf16>
    %cst_126 = arith.constant dense<0.000000e+00> : vector<8x128xf32>
    %393 = tpu.matmul %392, %246, %cst_126 {dimension_numbers = #tpu.dot_dimension_numbers<[1], [0], [0], [1], [0, 0, 1, 1], [], []>} : vector<8x64xbf16>, vector<64x128xbf16>, vector<8x128xf32> -> vector<8x128xf32>
    %394 = vector.broadcast %248 : vector<1x128xf32> to vector<8x128xf32>
    %395 = arith.addf %393, %394 : vector<8x128xf32>
    %396 = arith.negf %395 : vector<8x128xf32>
    %397 = math.exp %396 : vector<8x128xf32>
    %cst_127 = arith.constant 1.000000e+00 : f32
    %398 = vector.broadcast %cst_127 : f32 to vector<8x128xf32>
    %399 = arith.addf %398, %397 : vector<8x128xf32>
    %400 = arith.divf %398, %399 : vector<8x128xf32>
    %401 = math.tanh %395 : vector<8x128xf32>
    %402 = vector.extract_strided_slice %400 {offsets = [0, 0], sizes = [8, 32], strides = [1, 1]} : vector<8x128xf32> to vector<8x32xf32>
    %403 = vector.extract_strided_slice %400 {offsets = [0, 32], sizes = [8, 32], strides = [1, 1]} : vector<8x128xf32> to vector<8x32xf32>
    %404 = vector.extract_strided_slice %400 {offsets = [0, 96], sizes = [8, 32], strides = [1, 1]} : vector<8x128xf32> to vector<8x32xf32>
    %405 = vector.extract_strided_slice %401 {offsets = [0, 64], sizes = [8, 32], strides = [1, 1]} : vector<8x128xf32> to vector<8x32xf32>
    %406 = arith.mulf %403, %388 : vector<8x32xf32>
    %407 = arith.mulf %402, %405 : vector<8x32xf32>
    %408 = arith.addf %406, %407 : vector<8x32xf32>
    %409 = math.tanh %408 : vector<8x32xf32>
    %410 = arith.mulf %404, %409 : vector<8x32xf32>
    %411 = tpu.concatenate %244, %242, %410, %408 in 1 : vector<8x32xf32>, vector<8x32xf32>, vector<8x32xf32>, vector<8x32xf32> -> vector<8x128xf32>
    %412 = math.tanh %411 : vector<8x128xf32>
    %413 = arith.truncf %412 : vector<8x128xf32> to vector<8x128xbf16>
    %c0_128 = arith.constant 0 : index
    %c0_129 = arith.constant 0 : index
    %414 = vector.load %arg6[%c0_128, %c0_129] : memref<128x128xbf16, #tpu.memory_space<vmem>>, vector<128x128xbf16>
    %cst_130 = arith.constant dense<0.000000e+00> : vector<8x128xf32>
    %415 = tpu.matmul %413, %414, %cst_130 {dimension_numbers = #tpu.dot_dimension_numbers<[1], [0], [0], [1], [0, 0, 1, 1], [], []>} : vector<8x128xbf16>, vector<128x128xbf16>, vector<8x128xf32> -> vector<8x128xf32>
    %c0_131 = arith.constant 0 : index
    %c0_132 = arith.constant 0 : index
    %416 = vector.load %arg7[%c0_131, %c0_132] : memref<1x128xf32, #tpu.memory_space<vmem>>, vector<1x128xf32>
    %417 = vector.broadcast %416 : vector<1x128xf32> to vector<8x128xf32>
    %418 = arith.addf %415, %417 : vector<8x128xf32>
    %c0_133 = arith.constant 0 : index
    %c0_134 = arith.constant 0 : index
    %419 = vector.load %arg8[%c0_133, %c0_134] : memref<8x128xf32, #tpu.memory_space<vmem>>, vector<8x128xf32>
    tpu.vector_store %arg8[%c0_133, %c0_134], %418 {strides = array<i32>} : memref<8x128xf32, #tpu.memory_space<vmem>>, vector<8x128xf32>,
    return
  }
}

</mosaic_0001>

<bundles_post_ra>
// kernel: qst_encoder_forward.1
= control target key start
LH: loop header
LB: loop body
LE: loop exit
PB: predicated region body
PF: predicated region fallthrough
CT: control target
= control target key end

     0   :  { %13 = vsyncpa [#allocation5], 0  ;;  %s2199_s0 = inlined_call_operand.vmem [shape: s32[2,8], index: 0, kind: input, shape index: {}]   ;;  %s2200_s1 = inlined_call_operand.vmem [shape: f32[50,1,16], index: 1, kind: input, shape index: {}]   ;;  %s2201_s2 = inlined_call_operand.hbm [shape: bf16[16,128], index: 2, kind: input, shape index: {}]   ;;  %s2202_s3 = inlined_call_operand.hbm [shape: bf16[32,128], index: 3, kind: input, shape index: {}]   ;;  %s2203_s4 = inlined_call_operand.hbm [shape: bf16[1,64,128], index: 4, kind: input, shape index: {}]   ;;  %s2204_s5 = inlined_call_operand.vmem [shape: f32[2,1,128], index: 5, kind: input, shape index: {}]   ;;  %s2205_s6 = inlined_call_operand.vmem [shape: bf16[128,128], index: 6, kind: input, shape index: {}]   ;;  %s2206_s7 = inlined_call_operand.hbm [shape: f32[1,128], index: 7, kind: input, shape index: {}]   ;;  %s2207_s8 = inlined_call_operand.vmem [shape: f32[8,128], index: 8, kind: output, shape index: {}]  }
   0x1   :  { %14 = vsyncpa [#allocation4], 0 }
   0x2   :  { %15 = vsyncpa [#allocation8], 0 }
   0x3   :  { %16 = vsyncpa [#allocation11], 0  ;;  %s45_s29 = sshll.u32 %s2202_s3, 4  ;;  %s1765_s30 = smov [#allocation7]   ;;  %s46_s29 = int_to_ptr.hbm [resolvable:$true] %s45_s29 }
   0x4   :  { %s47_s9 = sshll.u32 %s1765_s30, 4  ;;  %s22_s12 = sshll.u32 %s2199_s0, 4  ;;  %s48_s9 = int_to_ptr.vmem [resolvable:$true] %s47_s9  ;;  %s23_s12 = int_to_ptr.vmem [resolvable:$true] %s22_s12 }
   0x5   :  { %s1766_s13 = smov 64   ;;  %s1767_s14 = smov 4  }
   0x6   :  { %53 = dma.hbm_to_vmem [thread:$0]  %s46_s29, 256, %s48_s9, [#allocation8], %s1766_s13, %s1766_s13, %s1767_s14  }
   0x7   :  { %s1768_s15 = smov [#allocation3]   ;;  %s32_s3 = sshll.u32 %s2201_s2, 4  ;;  %s33_s3 = int_to_ptr.hbm [resolvable:$true] %s32_s3 }
   0x8   :  { %25 = dma.vmem_to_smem %s23_s12, 32, %s1768_s15, [#allocation5]  }
   0x9   :  { %s1769_s18 = smov [#allocation6]   ;;  %s58_s0 = sshll.u32 %s2203_s4, 4  ;;  %s59_s0 = int_to_ptr.hbm [resolvable:$true] %s58_s0 }
   0xa   :  { %s34_s19 = sshll.u32 %s1769_s18, 4  ;;  %s1770_s22 = smov [#allocation9]   ;;  %s35_s19 = int_to_ptr.vmem [resolvable:$true] %s34_s19 }
   0xb   :  { %40 = dma.hbm_to_vmem [thread:$0]  %s33_s3, 128, %s35_s19, [#allocation4], %s1766_s13, %s1766_s13, %s1767_s14  }
   0xc   :  { %s60_s23 = sshll.u32 %s1770_s22, 4  ;;  %s76_s26 = sshll.u32 %s2206_s7, 4  ;;  %s61_s23 = int_to_ptr.vmem [resolvable:$true] %s60_s23  ;;  %s77_s26 = int_to_ptr.hbm [resolvable:$true] %s76_s26 }
   0xd   :  { %66 = dma.hbm_to_vmem [thread:$0]  %s59_s0, 512, %s61_s23, [#allocation8], %s1766_s13, %s1766_s13, %s1767_s14  }
   0xe   :  { %s1771_s2 = smov [#allocation10]  }
   0xf   :  { %s78_s27 = sshll.u32 %s1771_s2, 4  ;;  %s79_s27 = int_to_ptr.vmem [resolvable:$true] %s78_s27 }
  0x10   :  { %81 = dma.hbm_to_vmem [thread:$0]  %s77_s26, 16, %s79_s27, [#allocation11]  }
  0x11   :  { %1757 = dma.done.wait [#allocation5], 32  }
  0x12   :  { %1758 = vsyncadd [#allocation5], 4294967264 }
  0x13   :  { %1759 = dma.done.wait [#allocation4], 128  }
  0x14   :  { %1760 = vsyncadd [#allocation4], 4294967168 }
  0x15   :  { %1761 = dma.done.wait [#allocation8], 768  }
  0x16   :  { %1762 = vsyncadd [#allocation8], 4294966528 }
  0x17   :  { %1763 = dma.done.wait [#allocation11], 16  }
  0x18   :  { %1764 = vsyncadd [#allocation11], 4294967280 }
  0x19   :  { %102 = sfence }
  0x1a   :  { %v1489_v0 = vld [vmem:[#allocation6] sm:$0xff]  ;;  %vm104_vm0 = vcmask 130048   ;;  %s1389_s4 = sld [smem:[#allocation3 + $0x6]]  ;;  %v1772_v1 = vmov 0.0   ;;  %v1843_v2 = vld [vmem:[#allocation7 + $0x8] sm:$0xff]  ;;  %v1850_v3 = vld [vmem:[#allocation7] sm:$0xff] }
  0x1b   :  { %111 = vst.msk [vmem:[#allocation2 + $0x30] sm:$0xff] %vm104_vm0, %v1772_v1  ;;  %s1390_s7 = sld [smem:[#allocation3 + $0x86]]  ;;  %1504 = vmatpush.bf16.msra.mxu1 %v1489_v0  ;;  %221 = vmatpush.bf16.msra.mxu0 %v1489_v0  ;;  %vm116_vm1 = vcmask 122880   ;;  %v1773_v18 = vmov 0   ;;  %v1912_v21 = vld [vmem:[%s2204_s5] ss:$0 sm:$0xff] }
  0x1c   :  { %112 = vst.msk [vmem:[#allocation2 + $0x38] sm:$0xff] %vm104_vm0, %v1772_v1  ;;  %s1391_s28 = sld [smem:[#allocation3 + $0x7]]  ;;  %327 = vmatpush.bf16.msra.mxu2 %v1843_v2  ;;  %385 = vmatpush.bf16.msra.mxu3 %v1843_v2  ;;  %vm259_vm6 = vcmask 261120  }
  0x1d   :  { %s1846_s29 = sld [smem:[#allocation3 + $0x87]]  ;;  %105 = vst.msk [vmem:[#allocation2] sm:$0xff] %vm104_vm0, %v1772_v1 }
  0x1e   :  { %106 = vst.msk [vmem:[#allocation2 + $0x8] sm:$0xff] %vm104_vm0, %v1772_v1  ;;  %s113_s30 = sld [smem:[#allocation3]] }
  0x1f   :  { %269 = vmatpush.bf16.msrb.mxu1 %v1843_v2  ;;  %107 = vst.msk [vmem:[#allocation2 + $0x10] sm:$0xff] %vm104_vm0, %v1772_v1  ;;  %s1378_s9 = sld [smem:[#allocation3 + $0x80]] }
  0x20   :  { %s163_s12 = scalar_lea.vmem %s2200_s1, %s1389_s4  ;;  %108 = vst.msk [vmem:[#allocation2 + $0x18] sm:$0xff] %vm104_vm0, %v1772_v1  ;;  %s1379_s14 = sld [smem:[#allocation3 + $0x1]]  ;;  %328 = vmatpush.bf16.msra.mxu2 %v1850_v3  ;;  %386 = vmatpush.bf16.msra.mxu3 %v1850_v3 }
  0x21   :  { %v164_v4 = vld [vmem:[%s163_s12] sm:$0x1]  ;;  %s167_s17 = scalar_lea.vmem %s2200_s1, %s1390_s7  ;;  %109 = vst.msk [vmem:[#allocation2 + $0x20] sm:$0xff] %vm104_vm0, %v1772_v1  ;;  %s1380_s3 = sld [smem:[#allocation3 + $0x81]] }
  0x22   :  { %165 = vst.msk [vmem:[#allocation2 + $0x30] sm:$0x1] %vm116_vm1, %v164_v4  ;;  %v168_v5 = vld [vmem:[%s167_s17] sm:$0x1]  ;;  %s171_s20 = scalar_lea.vmem %s2200_s1, %s1391_s28  ;;  %s1774_s12 = smov 32  }
  0x23   :  { %270 = vmatpush.bf16.msrb.mxu1 %v1850_v3  ;;  %169 = vst.msk [vmem:[#allocation2 + $0x31] sm:$0x1] %vm116_vm1, %v168_v5  ;;  %v172_v6 = vld [vmem:[%s171_s20] sm:$0x1]  ;;  %s175_s22 = scalar_lea.vmem %s2200_s1, %s1846_s29  ;;  %s1382_s15 = sld [smem:[#allocation3 + $0x82]] }
  0x24   :  { %501 = vmatpush.bf16.msrb.mxu2 %v1843_v2  ;;  %559 = vmatpush.bf16.msrb.mxu3 %v1843_v2  ;;  %173 = vst.msk [vmem:[#allocation2 + $0x38] sm:$0x1] %vm116_vm1, %v172_v6  ;;  %v176_v7 = vld [vmem:[%s175_s22] sm:$0x1]  ;;  %s114_s25 = scalar_lea.vmem %s2200_s1, %s113_s30  ;;  %s1383_s16 = sld [smem:[#allocation3 + $0x3]] }
  0x25   :  { %177 = vst.msk [vmem:[#allocation2 + $0x39] sm:$0x1] %vm116_vm1, %v176_v7  ;;  %v115_v8 = vld [vmem:[%s114_s25] sm:$0x1]  ;;  %s119_s27 = scalar_lea.vmem %s2200_s1, %s1378_s9  ;;  %s1384_s17 = sld [smem:[#allocation3 + $0x83]] }
  0x26   :  { %110 = vst.msk [vmem:[#allocation2 + $0x28] sm:$0xff] %vm104_vm0, %v1772_v1  ;;  %v120_v9 = vld [vmem:[%s119_s27] sm:$0x1]  ;;  %s123_s28 = scalar_lea.vmem %s2200_s1, %s1379_s14  ;;  %s1381_s14 = sld [smem:[#allocation3 + $0x2]] }
  0x27   :  { %117 = vst.msk [vmem:[#allocation2] sm:$0x1] %vm116_vm1, %v115_v8  ;;  %v124_v10 = vld [vmem:[%s123_s28] sm:$0x1]  ;;  %s127_s10 = scalar_lea.vmem %s2200_s1, %s1380_s3  ;;  %s1385_s27 = sld [smem:[#allocation3 + $0x4]] }
  0x28   :  { %502 = vmatpush.bf16.msrb.mxu2 %v1850_v3  ;;  %560 = vmatpush.bf16.msrb.mxu3 %v1850_v3  ;;  %121 = vst.msk [vmem:[#allocation2 + $0x1] sm:$0x1] %vm116_vm1, %v120_v9  ;;  %v128_v11 = vld [vmem:[%s127_s10] sm:$0x1]  ;;  %s1386_s4 = sld [smem:[#allocation3 + $0x84]] }
  0x29   :  { %125 = vst.msk [vmem:[#allocation2 + $0x8] sm:$0x1] %vm116_vm1, %v124_v10  ;;  %s135_s0 = scalar_lea.vmem %s2200_s1, %s1382_s15  ;;  %s1387_s7 = sld [smem:[#allocation3 + $0x5]] }
  0x2a   :  { %v184_v12 = vld [vmem:[#allocation2 + $0x30] sm:$0xff]  ;;  %129 = vst.msk [vmem:[#allocation2 + $0x9] sm:$0x1] %vm116_vm1, %v128_v11  ;;  %s139_s24 = scalar_lea.vmem %s2200_s1, %s1383_s16  ;;  %s1388_s28 = sld [smem:[#allocation3 + $0x85]] }
  0x2b   :  { %s143_s2 = scalar_lea.vmem %s2200_s1, %s1384_s17 }
  0x2c   :  { %v185_v13 = vld [vmem:[#allocation2 + $0x38] sm:$0xff]  ;;  %s131_s19 = scalar_lea.vmem %s2200_s1, %s1381_s14 }
  0x2d   :  { %v189_v14 = vpack.c.bf16 %v185_v13, %v184_v12  ;;  %v132_v12 = vld [vmem:[%s131_s19] sm:$0x1]  ;;  %s147_s10 = scalar_lea.vmem %s2200_s1, %s1385_s27 }
  0x2e   :  { %v136_v13 = vld [vmem:[%s135_s0] sm:$0x1]  ;;  %133 = vst.msk [vmem:[#allocation2 + $0x10] sm:$0x1] %vm116_vm1, %v132_v12  ;;  %s151_s14 = scalar_lea.vmem %s2200_s1, %s1386_s4 }
  0x2f   :  { %1400 = vmatmul.msk.bf16.vlgmr.msra.gmra.mxu1 %vm104_vm0, %v189_v14  ;;  %v178_v15 = vld [vmem:[#allocation2] sm:$0xff]  ;;  %137 = vst.msk [vmem:[#allocation2 + $0x11] sm:$0x1] %vm116_vm1, %v136_v13  ;;  %s155_s17 = scalar_lea.vmem %s2200_s1, %s1387_s7 }
  0x30   :  { %443 = vmatpush.bf16.msra.mxu1 %v1843_v2  ;;  %v140_v14 = vld [vmem:[%s139_s24] sm:$0x1]  ;;  %s159_s19 = scalar_lea.vmem %s2200_s1, %s1388_s28 }
  0x31   :  { %v179_v16 = vld [vmem:[#allocation2 + $0x8] sm:$0xff]  ;;  %141 = vst.msk [vmem:[#allocation2 + $0x18] sm:$0x1] %vm116_vm1, %v140_v14 }
  0x32   :  { %v186_v17 = vpack.c.bf16 %v179_v16, %v178_v15  ;;  %v144_v15 = vld [vmem:[%s143_s2] sm:$0x1]  ;;  %s1775_s2 = smov 96  }
  0x33   :  { %145 = vst.msk [vmem:[#allocation2 + $0x19] sm:$0x1] %vm116_vm1, %v144_v15 }
  0x34   :  { %1397 = vmatmul.msk.bf16.vlgmr.msra.gmra.mxu0 %vm104_vm0, %v186_v17  ;;  %444 = vmatpush.bf16.msra.mxu1 %v1850_v3 }
  0x36   :  { %v180_v16 = vld [vmem:[#allocation2 + $0x10] sm:$0xff] }
  0x3a   :  { %v181_v17 = vld [vmem:[#allocation2 + $0x18] sm:$0xff] }
  0x3f   :  { %271 = vmatmul.bf16.vlgmr.msrb.gmra.mxu1 %v1773_v18  ;;  %v187_v18 = vpack.c.bf16 %v181_v17, %v180_v16  ;;  %v148_v17 = vld [vmem:[%s147_s10] sm:$0x1] }
  0x40   :  { %617 = vmatpush.bf16.msrb.mxu1 %v1843_v2  ;;  %149 = vst.msk [vmem:[#allocation2 + $0x20] sm:$0x1] %vm116_vm1, %v148_v17 }
  0x44   :  { %618 = vmatpush.bf16.msrb.mxu1 %v1850_v3  ;;  %1398 = vmatmul.msk.bf16.gmra.mxu0 %vm104_vm0, %v187_v18  ;;  %v152_v18 = vld [vmem:[%s151_s14] sm:$0x1] }
  0x45   :  { %153 = vst.msk [vmem:[#allocation2 + $0x21] sm:$0x1] %vm116_vm1, %v152_v18 }
  0xac   :  { %v1905_v19 = vpop.f32.mrf.mxu1 }
  0xb1   :  { %v223_v22 = vpop.f32.mrf.mxu0 }
  0xb2   :  { %v224_v23 = vadd.f32 %v1912_v21, %v223_v22 }
  0xb4   :  { %v1907_v20 = vpop.f32.mrf.mxu1 }
  0xb9   :  { %v225_v51 = vpop.f32.mrf.mxu0 }
  0xba   :  { %v226_v52 = vadd.f32 %v1912_v21, %v225_v51 }
  0xbc   :  { %v272_v24 = vpop.f32.mrf.mxu1 }
  0xbd   :  { %v276_v25 = vadd.f32 %v272_v24, %v224_v23 }
  0xbf   :  { %1519 = vtanh.f32 %v276_v25  ;;  %v1409_v28 = vmul.f32 -1.442695, %v276_v25 }
  0xc1   :  { %1521 = vpow2.f32 %v1409_v28 }
  0xc4   :  { %v274_v26 = vpop.f32.mrf.mxu1 }
  0xc5   :  { %v1520_v27 = vpop.eup %1519  ;;  %v228_v26 = vpop.f32.mrf.mxu0 }
  0xc6   :  { %299 = vrot.lane.b32.xlu0 %v1520_v27, %s1766_s13  ;;  %v229_v27 = vadd.f32 %v1912_v21, %v228_v26 }
  0xc7   :  { %v1522_v29 = vpop.eup %1521 }
  0xc8   :  { %v280_v30 = vadd.f32 1.0, %v1522_v29 }
  0xca   :  { %1523 = vrcp.f32 %v280_v30  ;;  %v292_v36 = vand.u32 2147483648, %v280_v30  ;;  %vm286_vm3 = vweird.f32 %v280_v30  ;;  %v290_v37 = vand.u32 2147483647, %v280_v30 }
  0xcc   :  { %v293_v39 = vor.u32 1.1754944e-38, %v292_v36  ;;  %vm291_vm5 = vcmp.eq.f32.partialorder %v290_v37, 8.507059e+37 }
  0xd0   :  { %v1524_v31 = vpop.eup %1523 }
  0xd1   :  { %v282_v32 = vmul.f32 %v1524_v31, %v280_v30  ;;  %vm287_vm2 = vweird.f32 %v1524_v31 }
  0xd2   :  { %vm288_vm4 = vmor %vm286_vm3, %vm287_vm2 }
  0xd3   :  { %v283_v33 = vsub.f32 1.0, %v282_v32 }
  0xd5   :  { %v284_v34 = vmul.f32 %v1524_v31, %v283_v33 }
  0xd7   :  { %v285_v35 = vadd.f32 %v1524_v31, %v284_v34 }
  0xd9   :  { %v289_v38 = vsel %vm288_vm4, %v1524_v31, %v285_v35 }
  0xda   :  { %v294_v41 = vsel %vm291_vm5, %v293_v39, %v289_v38 }
  0xdb   :  { %v297_v43 = vmul.f32 0.0, %v294_v41 }
 0x138   :  { %v300_v40 = vpop.permute.xlu0 %299 }
 0x139   :  { %v302_v42 = vmul.f32 %v300_v40, %v294_v41 }
 0x13b   :  { %304 = vrot.lane.b32.xlu0 %v302_v42, %s1774_s12 }
 0x1ad   :  { %v305_v44 = vpop.permute.xlu0 %304 }
 0x1ae   :  { %v307_v45 = vadd.f32 %v305_v44, %v297_v43 }
 0x1b0   :  { %1525 = vtanh.f32 %v307_v45 }
 0x1b6   :  { %v1526_v46 = vpop.eup %1525 }
 0x1b7   :  { %310 = vrot.lane.b32.xlu1 %v1526_v46, %s1766_s13 }
 0x229   :  { %v311_v47 = vpop.permute.xlu1 %310 }
 0x22a   :  { %v1918_v48 = vmul.f32 %v311_v47, %v294_v41 }
 0x22c   :  { %v314_v49 = vpack.c.bf16 %v1918_v48, %v1918_v48 }
 0x22e   :  { %316 = vrot.lane.b32.xlu1 %v314_v49, %s1774_s12 }
 0x2a0   :  { %v317_v50 = vpop.permute.xlu1 %316 }
 0x2a1   :  { %1410 = vmatmul.msk.bf16.vlgmr.msra.gmra.mxu2 %vm259_vm6, %v317_v50 }
 0x2a2   :  { %675 = vmatpush.bf16.msra.mxu2 %v1843_v2 }
 0x2a6   :  { %676 = vmatpush.bf16.msra.mxu2 %v1850_v3 }
 0x324   :  { %v330_v53 = vpop.f32.mrf.mxu2 }
 0x325   :  { %v334_v54 = vadd.f32 %v330_v53, %v226_v52 }
 0x327   :  { %1527 = vtanh.f32 %v334_v54  ;;  %v1411_v57 = vmul.f32 -1.442695, %v334_v54 }
 0x329   :  { %1529 = vpow2.f32 %v1411_v57 }
 0x32c   :  { %v332_v55 = vpop.f32.mrf.mxu2 }
 0x32d   :  { %v1528_v56 = vpop.eup %1527 }
 0x32e   :  { %357 = vrot.lane.b32.xlu2 %v1528_v56, %s1766_s13  ;;  %v230_v56 = vpop.f32.mrf.mxu0 }
 0x32f   :  { %v1530_v58 = vpop.eup %1529  ;;  %v231_v57 = vadd.f32 %v1912_v21, %v230_v56 }
 0x330   :  { %v338_v59 = vadd.f32 1.0, %v1530_v58 }
 0x332   :  { %1531 = vrcp.f32 %v338_v59  ;;  %v350_v1 = vand.u32 2147483648, %v338_v59  ;;  %vm344_vm8 = vweird.f32 %v338_v59  ;;  %v348_v2 = vand.u32 2147483647, %v338_v59 }
 0x334   :  { %v351_v4 = vor.u32 1.1754944e-38, %v350_v1  ;;  %vm349_vm10 = vcmp.eq.f32.partialorder %v348_v2, 8.507059e+37 }
 0x338   :  { %v1532_v60 = vpop.eup %1531 }
 0x339   :  { %v340_v61 = vmul.f32 %v1532_v60, %v338_v59  ;;  %vm345_vm7 = vweird.f32 %v1532_v60 }
 0x33a   :  { %vm346_vm9 = vmor %vm344_vm8, %vm345_vm7  ;;  %vm763_vm8 = vcmask 523264  }
 0x33b   :  { %v341_v62 = vsub.f32 1.0, %v340_v61 }
 0x33d   :  { %v342_v63 = vmul.f32 %v1532_v60, %v341_v62 }
 0x33f   :  { %v343_v0 = vadd.f32 %v1532_v60, %v342_v63 }
 0x341   :  { %v347_v3 = vsel %vm346_vm9, %v1532_v60, %v343_v0 }
 0x342   :  { %v352_v6 = vsel %vm349_vm10, %v351_v4, %v347_v3 }
 0x343   :  { %v355_v8 = vmul.f32 %v352_v6, %v307_v45 }
 0x388   :  { %v358_v5 = vpop.permute.xlu2 %357 }
 0x389   :  { %v360_v7 = vmul.f32 %v358_v5, %v352_v6 }
 0x38b   :  { %362 = vrot.lane.b32.xlu2 %v360_v7, %s1774_s12 }
 0x3e5   :  { %v363_v9 = vpop.permute.xlu2 %362 }
 0x3e6   :  { %v365_v10 = vadd.f32 %v363_v9, %v355_v8 }
 0x3e8   :  { %1533 = vtanh.f32 %v365_v10 }
 0x3ee   :  { %v1534_v11 = vpop.eup %1533 }
 0x3ef   :  { %368 = vrot.lane.b32.xlu0 %v1534_v11, %s1766_s13 }
 0x461   :  { %v369_v22 = vpop.permute.xlu0 %368 }
 0x462   :  { %v1947_v23 = vmul.f32 %v369_v22, %v352_v6  ;;  %v156_v22 = vld [vmem:[%s155_s17] sm:$0x1] }
 0x463   :  { %157 = vst.msk [vmem:[#allocation2 + $0x28] sm:$0x1] %vm116_vm1, %v156_v22 }
 0x464   :  { %v372_v24 = vpack.c.bf16 %v1947_v23, %v1947_v23 }
 0x466   :  { %374 = vrot.lane.b32.xlu1 %v372_v24, %s1774_s12  ;;  %v160_v24 = vld [vmem:[%s159_s19] sm:$0x1] }
 0x467   :  { %161 = vst.msk [vmem:[#allocation2 + $0x29] sm:$0x1] %vm116_vm1, %v160_v24 }
 0x46e   :  { %v183_v26 = vld [vmem:[#allocation2 + $0x28] sm:$0xff] }
 0x4d8   :  { %v375_v25 = vpop.permute.xlu1 %374 }
 0x4d9   :  { %1412 = vmatmul.msk.bf16.vlgmr.msra.gmra.mxu3 %vm259_vm6, %v375_v25  ;;  %v182_v25 = vld [vmem:[#allocation2 + $0x20] sm:$0xff] }
 0x55c   :  { %v388_v28 = vpop.f32.mrf.mxu3 }
 0x55d   :  { %v392_v29 = vadd.f32 %v388_v28, %v229_v27  ;;  %v188_v27 = vpack.c.bf16 %v183_v26, %v182_v25 }
 0x55f   :  { %1535 = vtanh.f32 %v392_v29  ;;  %v1413_v32 = vmul.f32 -1.442695, %v392_v29  ;;  %1399 = vmatmul.msk.bf16.gmra.mxu0 %vm104_vm0, %v188_v27 }
 0x561   :  { %1537 = vpow2.f32 %v1413_v32 }
 0x564   :  { %v390_v30 = vpop.f32.mrf.mxu3 }
 0x565   :  { %v1536_v31 = vpop.eup %1535 }
 0x566   :  { %415 = vrot.lane.b32.xlu2 %v1536_v31, %s1766_s13 }
 0x567   :  { %v1538_v33 = vpop.eup %1537 }
 0x568   :  { %v396_v34 = vadd.f32 1.0, %v1538_v33 }
 0x56a   :  { %1539 = vrcp.f32 %v396_v34  ;;  %v408_v40 = vand.u32 2147483648, %v396_v34  ;;  %vm402_vm12 = vweird.f32 %v396_v34  ;;  %v406_v41 = vand.u32 2147483647, %v396_v34 }
 0x56c   :  { %v409_v43 = vor.u32 1.1754944e-38, %v408_v40  ;;  %vm407_vm14 = vcmp.eq.f32.partialorder %v406_v41, 8.507059e+37 }
 0x570   :  { %v1540_v35 = vpop.eup %1539 }
 0x571   :  { %v398_v36 = vmul.f32 %v1540_v35, %v396_v34  ;;  %vm403_vm11 = vweird.f32 %v1540_v35 }
 0x572   :  { %vm404_vm13 = vmor %vm402_vm12, %vm403_vm11 }
 0x573   :  { %v399_v37 = vsub.f32 1.0, %v398_v36 }
 0x575   :  { %v400_v38 = vmul.f32 %v1540_v35, %v399_v37 }
 0x577   :  { %v401_v39 = vadd.f32 %v1540_v35, %v400_v38 }
 0x579   :  { %v405_v42 = vsel %vm404_vm13, %v1540_v35, %v401_v39 }
 0x57a   :  { %v410_v45 = vsel %vm407_vm14, %v409_v43, %v405_v42 }
 0x57b   :  { %v413_v47 = vmul.f32 %v410_v45, %v365_v10 }
 0x5c0   :  { %v416_v44 = vpop.permute.xlu2 %415 }
 0x5c1   :  { %v418_v46 = vmul.f32 %v416_v44, %v410_v45 }
 0x5c3   :  { %420 = vrot.lane.b32.xlu0 %v418_v46, %s1774_s12 }
 0x5dc   :  { %v233_v32 = vpop.f32.mrf.mxu0 }
 0x5dd   :  { %v234_v33 = vadd.f32 %v1912_v21, %v233_v32 }
 0x635   :  { %v421_v49 = vpop.permute.xlu0 %420 }
 0x636   :  { %v423_v50 = vadd.f32 %v421_v49, %v413_v47 }
 0x638   :  { %1541 = vtanh.f32 %v423_v50 }
 0x63e   :  { %v1542_v51 = vpop.eup %1541 }
 0x63f   :  { %426 = vrot.lane.b32.xlu1 %v1542_v51, %s1766_s13 }
 0x6b1   :  { %v427_v52 = vpop.permute.xlu1 %426 }
 0x6b2   :  { %v1957_v53 = vmul.f32 %v427_v52, %v410_v45 }
 0x6b4   :  { %v430_v54 = vpack.c.bf16 %v1957_v53, %v1957_v53 }
 0x6b6   :  { %432 = vrot.lane.b32.xlu2 %v430_v54, %s1774_s12 }
 0x710   :  { %v433_v55 = vpop.permute.xlu2 %432 }
 0x711   :  { %1414 = vmatmul.msk.bf16.vlgmr.msra.gmra.mxu1 %vm259_vm6, %v433_v55 }
 0x78e   :  { %v446_v58 = vpop.f32.mrf.mxu1 }
 0x78f   :  { %v450_v59 = vadd.f32 %v446_v58, %v231_v57 }
 0x791   :  { %1543 = vtanh.f32 %v450_v59  ;;  %v1415_v62 = vmul.f32 -1.442695, %v450_v59 }
 0x793   :  { %1545 = vpow2.f32 %v1415_v62  ;;  %v2004_v62 = vld [vmem:[#allocation9 + $0x18] sm:$0xff] }
 0x794   :  { %771 = vmatpush.bf16.msra.mxu3 %v2004_v62  ;;  %834 = vmatpush.bf16.msra.mxu1 %v2004_v62 }
 0x795   :  { %1023 = vmatpush.bf16.msrb.mxu0 %v2004_v62 }
 0x796   :  { %v448_v60 = vpop.f32.mrf.mxu1 }
 0x797   :  { %v1544_v61 = vpop.eup %1543 }
 0x798   :  { %473 = vrot.lane.b32.xlu0 %v1544_v61, %s1766_s13 }
 0x799   :  { %v1546_v63 = vpop.eup %1545 }
 0x79a   :  { %v454_v0 = vadd.f32 1.0, %v1546_v63  ;;  %v2013_v63 = vld [vmem:[#allocation9 + $0x8] sm:$0xff] }
 0x79c   :  { %1547 = vrcp.f32 %v454_v0  ;;  %v466_v6 = vand.u32 2147483648, %v454_v0  ;;  %vm460_vm2 = vweird.f32 %v454_v0  ;;  %v464_v7 = vand.u32 2147483647, %v454_v0 }
 0x79e   :  { %v467_v9 = vor.u32 1.1754944e-38, %v466_v6  ;;  %vm465_vm4 = vcmp.eq.f32.partialorder %v464_v7, 8.507059e+37 }
 0x7a2   :  { %v1548_v1 = vpop.eup %1547 }
 0x7a3   :  { %v456_v2 = vmul.f32 %v1548_v1, %v454_v0  ;;  %vm461_vm15 = vweird.f32 %v1548_v1  ;;  %v2019_v0 = vld [vmem:[#allocation9] sm:$0xff] }
 0x7a4   :  { %vm462_vm3 = vmor %vm460_vm2, %vm461_vm15 }
 0x7a5   :  { %v457_v3 = vsub.f32 1.0, %v456_v2 }
 0x7a7   :  { %v458_v4 = vmul.f32 %v1548_v1, %v457_v3 }
 0x7a9   :  { %v459_v5 = vadd.f32 %v1548_v1, %v458_v4 }
 0x7ab   :  { %v463_v8 = vsel %vm462_vm3, %v1548_v1, %v459_v5  ;;  %v235_v5 = vpop.f32.mrf.mxu0 }
 0x7ac   :  { %v468_v11 = vsel %vm465_vm4, %v467_v9, %v463_v8  ;;  %v236_v6 = vadd.f32 %v1912_v21, %v235_v5 }
 0x7ad   :  { %v471_v13 = vmul.f32 %v468_v11, %v423_v50 }
 0x80a   :  { %v474_v10 = vpop.permute.xlu0 %473 }
 0x80b   :  { %v476_v12 = vmul.f32 %v474_v10, %v468_v11 }
 0x80d   :  { %478 = vrot.lane.b32.xlu1 %v476_v12, %s1774_s12 }
 0x87f   :  { %v479_v14 = vpop.permute.xlu1 %478 }
 0x880   :  { %v481_v15 = vadd.f32 %v479_v14, %v471_v13 }
 0x882   :  { %1549 = vtanh.f32 %v481_v15 }
 0x888   :  { %v1550_v16 = vpop.eup %1549 }
 0x889   :  { %484 = vrot.lane.b32.xlu2 %v1550_v16, %s1766_s13 }
 0x8e3   :  { %v485_v28 = vpop.permute.xlu2 %484 }
 0x8e4   :  { %v1984_v29 = vmul.f32 %v485_v28, %v468_v11  ;;  %v2044_v11 = vld [vmem:[%s2204_s5 + $0x1] ss:$0 sm:$0xff] }
 0x8e6   :  { %v488_v30 = vpack.c.bf16 %v1984_v29, %v1984_v29 }
 0x8e8   :  { %490 = vrot.lane.b32.xlu0 %v488_v30, %s1774_s12 }
 0x95a   :  { %v491_v31 = vpop.permute.xlu0 %490 }
 0x95b   :  { %1416 = vmatmul.msk.bf16.vlgmr.msrb.gmra.mxu2 %vm259_vm6, %v491_v31 }
 0x95c   :  { %897 = vmatpush.bf16.msrb.mxu2 %v2004_v62 }
 0x9de   :  { %v504_v34 = vpop.f32.mrf.mxu2 }
 0x9df   :  { %v508_v35 = vadd.f32 %v504_v34, %v234_v33 }
 0x9e1   :  { %1551 = vtanh.f32 %v508_v35  ;;  %v1417_v38 = vmul.f32 -1.442695, %v508_v35 }
 0x9e3   :  { %1553 = vpow2.f32 %v1417_v38 }
 0x9e6   :  { %v506_v36 = vpop.f32.mrf.mxu2 }
 0x9e7   :  { %v1552_v37 = vpop.eup %1551 }
 0x9e8   :  { %531 = vrot.lane.b32.xlu1 %v1552_v37, %s1766_s13 }
 0x9e9   :  { %v1554_v39 = vpop.eup %1553 }
 0x9ea   :  { %v512_v40 = vadd.f32 1.0, %v1554_v39 }
 0x9ec   :  { %1555 = vrcp.f32 %v512_v40  ;;  %v524_v46 = vand.u32 2147483648, %v512_v40  ;;  %vm518_vm1 = vweird.f32 %v512_v40  ;;  %v522_v47 = vand.u32 2147483647, %v512_v40 }
 0x9ee   :  { %v525_v50 = vor.u32 1.1754944e-38, %v524_v46  ;;  %vm523_vm7 = vcmp.eq.f32.partialorder %v522_v47, 8.507059e+37 }
 0x9f2   :  { %v1556_v41 = vpop.eup %1555 }
 0x9f3   :  { %v514_v42 = vmul.f32 %v1556_v41, %v512_v40  ;;  %vm519_vm0 = vweird.f32 %v1556_v41 }
 0x9f4   :  { %vm520_vm5 = vmor %vm518_vm1, %vm519_vm0 }
 0x9f5   :  { %v515_v43 = vsub.f32 1.0, %v514_v42 }
 0x9f7   :  { %v516_v44 = vmul.f32 %v1556_v41, %v515_v43 }
 0x9f9   :  { %v517_v45 = vadd.f32 %v1556_v41, %v516_v44 }
 0x9fb   :  { %v521_v49 = vsel %vm520_vm5, %v1556_v41, %v517_v45 }
 0x9fc   :  { %v526_v52 = vsel %vm523_vm7, %v525_v50, %v521_v49 }
 0x9fd   :  { %v529_v55 = vmul.f32 %v526_v52, %v481_v15 }
 0xa5a   :  { %v532_v51 = vpop.permute.xlu1 %531 }
 0xa5b   :  { %v534_v54 = vmul.f32 %v532_v51, %v526_v52 }
 0xa5d   :  { %536 = vrot.lane.b32.xlu2 %v534_v54, %s1774_s12 }
 0xa65   :  { %731 = vrot.lane.b32.xlu2 %v1918_v48, %s1774_s12  ;;  %v2007_v48 = vld [vmem:[#allocation9 + $0x10] sm:$0xff] }
 0xa66   :  { %772 = vmatpush.bf16.msra.mxu3 %v2007_v48  ;;  %835 = vmatpush.bf16.msra.mxu1 %v2007_v48 }
 0xa67   :  { %898 = vmatpush.bf16.msrb.mxu2 %v2007_v48  ;;  %1024 = vmatpush.bf16.msrb.mxu0 %v2007_v48 }
 0xa6a   :  { %773 = vmatpush.bf16.msra.mxu3 %v2013_v63  ;;  %836 = vmatpush.bf16.msra.mxu1 %v2013_v63 }
 0xa6b   :  { %899 = vmatpush.bf16.msrb.mxu2 %v2013_v63  ;;  %1025 = vmatpush.bf16.msrb.mxu0 %v2013_v63 }
 0xa6e   :  { %774 = vmatpush.bf16.msra.mxu3 %v2019_v0  ;;  %837 = vmatpush.bf16.msra.mxu1 %v2019_v0 }
 0xa6f   :  { %900 = vmatpush.bf16.msrb.mxu2 %v2019_v0  ;;  %1026 = vmatpush.bf16.msrb.mxu0 %v2019_v0 }
 0xab7   :  { %v537_v56 = vpop.permute.xlu2 %536 }
 0xab8   :  { %v1995_v57 = vadd.f32 %v537_v56, %v529_v55 }
 0xaba   :  { %1557 = vtanh.f32 %v1995_v57 }
 0xabf   :  { %v732_v2 = vpop.permute.xlu2 %731 }
 0xac0   :  { %v1558_v58 = vpop.eup %1557  ;;  %v734_v3 = vsel %vm259_vm6, %v732_v2, 0.0 }
 0xac1   :  { %542 = vrot.lane.b32.xlu0 %v1558_v58, %s1766_s13  ;;  %v735_v4 = vpack.c.bf16 %v734_v3, %v734_v3 }
 0xb33   :  { %v543_v59 = vpop.permute.xlu0 %542 }
 0xb34   :  { %v1999_v60 = vmul.f32 %v543_v59, %v526_v52 }
 0xb36   :  { %v546_v61 = vpack.c.bf16 %v1999_v60, %v1999_v60 }
 0xb38   :  { %548 = vrot.lane.b32.xlu1 %v546_v61, %s1774_s12 }
 0xbaa   :  { %v549_v1 = vpop.permute.xlu1 %548 }
 0xbab   :  { %1418 = vmatmul.msk.bf16.vlgmr.msrb.gmra.mxu3 %vm259_vm6, %v549_v1 }
 0xbac   :  { %960 = vmatpush.bf16.msrb.mxu3 %v2004_v62 }
 0xbb0   :  { %961 = vmatpush.bf16.msrb.mxu3 %v2007_v48 }
 0xbb4   :  { %962 = vmatpush.bf16.msrb.mxu3 %v2013_v63 }
 0xbb8   :  { %963 = vmatpush.bf16.msrb.mxu3 %v2019_v0 }
 0xbbb   :  { %1441 = vmatmul.msk.bf16.vlgmr.msra.gmra.mxu3 %vm763_vm8, %v735_v4 }
 0xbbc   :  { %1212 = vmatpush.bf16.msra.mxu3 %v2004_v62 }
 0xbc0   :  { %1213 = vmatpush.bf16.msra.mxu3 %v2007_v48 }
 0xbc4   :  { %1214 = vmatpush.bf16.msra.mxu3 %v2013_v63 }
 0xbc8   :  { %1215 = vmatpush.bf16.msra.mxu3 %v2019_v0 }
 0xc2e   :  { %v562_v7 = vpop.f32.mrf.mxu3 }
 0xc2f   :  { %v566_v8 = vadd.f32 %v562_v7, %v236_v6 }
 0xc31   :  { %1559 = vtanh.f32 %v566_v8  ;;  %v1419_v16 = vmul.f32 -1.442695, %v566_v8 }
 0xc36   :  { %v564_v9 = vpop.f32.mrf.mxu3 }
 0xc37   :  { %v1560_v10 = vpop.eup %1559 }
 0xc38   :  { %589 = vrot.lane.b32.xlu0 %v1560_v10, %s1766_s13  ;;  %v239_v10 = vadd.f32 %v1912_v21, %v1905_v19 }
 0xc3e   :  { %v776_v12 = vpop.f32.mrf.mxu3 }
 0xc3f   :  { %v777_v13 = vadd.f32 %v2044_v11, %v776_v12 }
 0xc41   :  { %1561 = vtanh.f32 %v777_v13  ;;  %v1442_v22 = vmul.f32 -1.442695, %v777_v13 }
 0xc42   :  { %1563 = vpow2.f32 %v1419_v16 }
 0xc46   :  { %v778_v14 = vpop.f32.mrf.mxu3 }
 0xc47   :  { %v1562_v15 = vpop.eup %1561 }
 0xc48   :  { %802 = vrot.lane.b32.xlu1 %v1562_v15, %s1766_s13  ;;  %v1564_v17 = vpop.eup %1563 }
 0xc49   :  { %v570_v18 = vadd.f32 1.0, %v1564_v17 }
 0xc4b   :  { %1565 = vrcp.f32 %v570_v18  ;;  %v582_v33 = vand.u32 2147483648, %v570_v18  ;;  %vm576_vm10 = vweird.f32 %v570_v18  ;;  %v580_v34 = vand.u32 2147483647, %v570_v18 }
 0xc4c   :  { %1567 = vpow2.f32 %v1442_v22 }
 0xc4d   :  { %v583_v37 = vor.u32 1.1754944e-38, %v582_v33  ;;  %vm581_vm12 = vcmp.eq.f32.partialorder %v580_v34, 8.507059e+37 }
 0xc51   :  { %v1566_v24 = vpop.eup %1565 }
 0xc52   :  { %v1568_v25 = vpop.eup %1567  ;;  %v572_v26 = vmul.f32 %v1566_v24, %v570_v18  ;;  %vm577_vm9 = vweird.f32 %v1566_v24 }
 0xc53   :  { %v783_v27 = vadd.f32 1.0, %v1568_v25  ;;  %vm578_vm11 = vmor %vm576_vm10, %vm577_vm9 }
 0xc54   :  { %v573_v28 = vsub.f32 1.0, %v572_v26 }
 0xc55   :  { %1569 = vrcp.f32 %v783_v27  ;;  %v795_v44 = vand.u32 2147483648, %v783_v27  ;;  %vm789_vm14 = vweird.f32 %v783_v27  ;;  %v793_v45 = vand.u32 2147483647, %v783_v27 }
 0xc56   :  { %v574_v30 = vmul.f32 %v1566_v24, %v573_v28 }
 0xc57   :  { %v796_v47 = vor.u32 1.1754944e-38, %v795_v44  ;;  %vm794_vm2 = vcmp.eq.f32.partialorder %v793_v45, 8.507059e+37 }
 0xc58   :  { %v575_v31 = vadd.f32 %v1566_v24, %v574_v30 }
 0xc5a   :  { %v579_v35 = vsel %vm578_vm11, %v1566_v24, %v575_v31 }
 0xc5b   :  { %v1570_v32 = vpop.eup %1569  ;;  %v584_v39 = vsel %vm581_vm12, %v583_v37, %v579_v35 }
 0xc5c   :  { %v785_v36 = vmul.f32 %v1570_v32, %v783_v27  ;;  %vm790_vm13 = vweird.f32 %v1570_v32  ;;  %v587_v52 = vmul.f32 %v584_v39, %v1995_v57 }
 0xc5d   :  { %vm791_vm15 = vmor %vm789_vm14, %vm790_vm13 }
 0xc5e   :  { %v786_v41 = vsub.f32 1.0, %v785_v36 }
 0xc60   :  { %v787_v42 = vmul.f32 %v1570_v32, %v786_v41 }
 0xc62   :  { %v788_v43 = vadd.f32 %v1570_v32, %v787_v42 }
 0xc64   :  { %v792_v46 = vsel %vm791_vm15, %v1570_v32, %v788_v43 }
 0xc65   :  { %v797_v50 = vsel %vm794_vm2, %v796_v47, %v792_v46 }
 0xc66   :  { %v800_v58 = vmul.f32 0.0, %v797_v50 }
 0xcaa   :  { %v590_v38 = vpop.permute.xlu0 %589 }
 0xcab   :  { %v592_v40 = vmul.f32 %v590_v38, %v584_v39 }
 0xcad   :  { %594 = vrot.lane.b32.xlu2 %v592_v40, %s1774_s12 }
 0xcba   :  { %v803_v49 = vpop.permute.xlu1 %802 }
 0xcbb   :  { %v805_v51 = vmul.f32 %v803_v49, %v797_v50 }
 0xcbd   :  { %807 = vrot.lane.b32.xlu0 %v805_v51, %s1774_s12 }
 0xd07   :  { %v595_v54 = vpop.permute.xlu2 %594 }
 0xd08   :  { %v2051_v55 = vadd.f32 %v595_v54, %v587_v52 }
 0xd0a   :  { %1571 = vtanh.f32 %v2051_v55 }
 0xd10   :  { %v1572_v56 = vpop.eup %1571 }
 0xd11   :  { %600 = vrot.lane.b32.xlu1 %v1572_v56, %s1766_s13 }
 0xd19   :  { %818 = vrot.lane.b32.xlu1 %v1947_v23, %s1774_s12 }
 0xd2f   :  { %v808_v59 = vpop.permute.xlu0 %807 }
 0xd30   :  { %v2057_v61 = vadd.f32 %v808_v59, %v800_v58 }
 0xd32   :  { %1573 = vtanh.f32 %v2057_v61 }
 0xd38   :  { %v1574_v1 = vpop.eup %1573 }
 0xd39   :  { %813 = vrot.lane.b32.xlu2 %v1574_v1, %s1766_s13 }
 0xd83   :  { %v601_v57 = vpop.permute.xlu1 %600 }
 0xd84   :  { %v2061_v2 = vmul.f32 %v601_v57, %v584_v39 }
 0xd86   :  { %v604_v3 = vpack.c.bf16 %v2061_v2, %v2061_v2 }
 0xd88   :  { %606 = vrot.lane.b32.xlu0 %v604_v3, %s1774_s12 }
 0xd8b   :  { %v819_v7 = vpop.permute.xlu1 %818 }
 0xd93   :  { %v814_v4 = vpop.permute.xlu2 %813 }
 0xd94   :  { %v816_v5 = vmul.f32 %v814_v4, %v797_v50 }
 0xd96   :  { %822 = vrot.lane.b32.xlu2 %v816_v5, %s1766_s13 }
 0xdf0   :  { %v823_v6 = vpop.permute.xlu2 %822 }
 0xdf1   :  { %v825_v8 = vsel %vm259_vm6, %v819_v7, %v823_v6 }
 0xdf2   :  { %v826_v9 = vpack.c.bf16 %v825_v8, %v825_v8 }
 0xdfa   :  { %v607_v23 = vpop.permute.xlu0 %606 }
 0xdfb   :  { %1420 = vmatmul.msk.bf16.vlgmr.msrb.gmra.mxu1 %vm259_vm6, %v607_v23 }
 0xdfc   :  { %1086 = vmatpush.bf16.msrb.mxu1 %v2004_v62 }
 0xe00   :  { %1087 = vmatpush.bf16.msrb.mxu1 %v2007_v48 }
 0xe04   :  { %1088 = vmatpush.bf16.msrb.mxu1 %v2013_v63 }
 0xe08   :  { %1089 = vmatpush.bf16.msrb.mxu1 %v2019_v0 }
 0xe0b   :  { %1443 = vmatmul.msk.bf16.vlgmr.msra.gmra.mxu1 %vm763_vm8, %v826_v9 }
 0xe78   :  { %v620_v12 = vpop.f32.mrf.mxu1 }
 0xe79   :  { %v624_v13 = vadd.f32 %v620_v12, %v239_v10 }
 0xe7b   :  { %1575 = vtanh.f32 %v624_v13  ;;  %v1421_v24 = vmul.f32 -1.442695, %v624_v13 }
 0xe80   :  { %v622_v14 = vpop.f32.mrf.mxu1 }
 0xe81   :  { %v1576_v15 = vpop.eup %1575  ;;  %v241_v14 = vadd.f32 %v1912_v21, %v1907_v20 }
 0xe82   :  { %647 = vrot.lane.b32.xlu0 %v1576_v15, %s1766_s13 }
 0xe88   :  { %v839_v16 = vpop.f32.mrf.mxu1 }
 0xe89   :  { %v840_v17 = vadd.f32 %v2044_v11, %v839_v16 }
 0xe8b   :  { %1577 = vtanh.f32 %v840_v17  ;;  %v1444_v19 = vmul.f32 -1.442695, %v840_v17 }
 0xe8c   :  { %1579 = vpow2.f32 %v1421_v24 }
 0xe90   :  { %v841_v18 = vpop.f32.mrf.mxu1 }
 0xe91   :  { %v1578_v22 = vpop.eup %1577 }
 0xe92   :  { %865 = vrot.lane.b32.xlu1 %v1578_v22, %s1766_s13  ;;  %v1580_v25 = vpop.eup %1579 }
 0xe93   :  { %v628_v26 = vadd.f32 1.0, %v1580_v25 }
 0xe95   :  { %1581 = vrcp.f32 %v628_v26  ;;  %v640_v36 = vand.u32 2147483648, %v628_v26  ;;  %vm634_vm4 = vweird.f32 %v628_v26  ;;  %v638_v37 = vand.u32 2147483647, %v628_v26 }
 0xe96   :  { %1583 = vpow2.f32 %v1444_v19 }
 0xe97   :  { %v641_v40 = vor.u32 1.1754944e-38, %v640_v36  ;;  %vm639_vm1 = vcmp.eq.f32.partialorder %v638_v37, 8.507059e+37 }
 0xe9b   :  { %v1582_v27 = vpop.eup %1581 }
 0xe9c   :  { %v1584_v28 = vpop.eup %1583  ;;  %v630_v30 = vmul.f32 %v1582_v27, %v628_v26  ;;  %vm635_vm3 = vweird.f32 %v1582_v27 }
 0xe9d   :  { %v846_v31 = vadd.f32 1.0, %v1584_v28  ;;  %vm636_vm0 = vmor %vm634_vm4, %vm635_vm3 }
 0xe9e   :  { %v631_v32 = vsub.f32 1.0, %v630_v30 }
 0xe9f   :  { %1585 = vrcp.f32 %v846_v31  ;;  %v858_v47 = vand.u32 2147483648, %v846_v31  ;;  %vm852_vm7 = vweird.f32 %v846_v31  ;;  %v856_v49 = vand.u32 2147483647, %v846_v31 }
 0xea0   :  { %v632_v33 = vmul.f32 %v1582_v27, %v631_v32 }
 0xea1   :  { %v859_v51 = vor.u32 1.1754944e-38, %v858_v47  ;;  %vm857_vm10 = vcmp.eq.f32.partialorder %v856_v49, 8.507059e+37 }
 0xea2   :  { %v633_v34 = vadd.f32 %v1582_v27, %v632_v33 }
 0xea4   :  { %v637_v38 = vsel %vm636_vm0, %v1582_v27, %v633_v34 }
 0xea5   :  { %v1586_v35 = vpop.eup %1585  ;;  %v642_v42 = vsel %vm639_vm1, %v641_v40, %v637_v38 }
 0xea6   :  { %v848_v39 = vmul.f32 %v1586_v35, %v846_v31  ;;  %vm853_vm5 = vweird.f32 %v1586_v35  ;;  %v645_v58 = vmul.f32 %v642_v42, %v2051_v55 }
 0xea7   :  { %vm854_vm9 = vmor %vm852_vm7, %vm853_vm5 }
 0xea8   :  { %v849_v44 = vsub.f32 1.0, %v848_v39 }
 0xeaa   :  { %v850_v45 = vmul.f32 %v1586_v35, %v849_v44 }
 0xeac   :  { %v851_v46 = vadd.f32 %v1586_v35, %v850_v45 }
 0xeae   :  { %v855_v50 = vsel %vm854_vm9, %v1586_v35, %v851_v46 }
 0xeaf   :  { %v860_v54 = vsel %vm857_vm10, %v859_v51, %v855_v50 }
 0xeb0   :  { %v863_v3 = vmul.f32 %v860_v54, %v2057_v61 }
 0xef4   :  { %v648_v41 = vpop.permute.xlu0 %647 }
 0xef5   :  { %v650_v43 = vmul.f32 %v648_v41, %v642_v42 }
 0xef7   :  { %652 = vrot.lane.b32.xlu2 %v650_v43, %s1774_s12 }
 0xf04   :  { %v866_v52 = vpop.permute.xlu1 %865 }
 0xf05   :  { %v868_v56 = vmul.f32 %v866_v52, %v860_v54 }
 0xf07   :  { %870 = vrot.lane.b32.xlu0 %v868_v56, %s1774_s12 }
 0xf51   :  { %v653_v59 = vpop.permute.xlu2 %652 }
 0xf52   :  { %v2082_v1 = vadd.f32 %v653_v59, %v645_v58 }
 0xf54   :  { %1587 = vtanh.f32 %v2082_v1 }
 0xf5a   :  { %v1588_v57 = vpop.eup %1587 }
 0xf5b   :  { %658 = vrot.lane.b32.xlu1 %v1588_v57, %s1766_s13 }
 0xf63   :  { %881 = vrot.lane.b32.xlu1 %v1957_v53, %s1774_s12 }
 0xf79   :  { %v871_v4 = vpop.permute.xlu0 %870 }
 0xf7a   :  { %v873_v5 = vadd.f32 %v871_v4, %v863_v3 }
 0xf7c   :  { %1589 = vtanh.f32 %v873_v5 }
 0xf82   :  { %v1590_v23 = vpop.eup %1589 }
 0xf83   :  { %876 = vrot.lane.b32.xlu2 %v1590_v23, %s1766_s13 }
 0xfcd   :  { %v659_v55 = vpop.permute.xlu1 %658 }
 0xfce   :  { %v2090_v6 = vmul.f32 %v659_v55, %v642_v42 }
 0xfd0   :  { %v662_v7 = vpack.c.bf16 %v2090_v6, %v2090_v6 }
 0xfd2   :  { %664 = vrot.lane.b32.xlu0 %v662_v7, %s1774_s12 }
 0xfd5   :  { %v882_v10 = vpop.permute.xlu1 %881 }
 0xfdd   :  { %v877_v8 = vpop.permute.xlu2 %876 }
 0xfde   :  { %v879_v9 = vmul.f32 %v877_v8, %v860_v54 }
 0xfe0   :  { %885 = vrot.lane.b32.xlu2 %v879_v9, %s1766_s13 }
0x103a   :  { %v886_v61 = vpop.permute.xlu2 %885 }
0x103b   :  { %v888_v12 = vsel %vm259_vm6, %v882_v10, %v886_v61 }
0x103c   :  { %v889_v13 = vpack.c.bf16 %v888_v12, %v888_v12 }
0x1044   :  { %v665_v53 = vpop.permute.xlu0 %664 }
0x1045   :  { %1422 = vmatmul.msk.bf16.vlgmr.msra.gmra.mxu2 %vm259_vm6, %v665_v53 }
0x1046   :  { %1149 = vmatpush.bf16.msra.mxu2 %v2004_v62 }
0x104a   :  { %1150 = vmatpush.bf16.msra.mxu2 %v2007_v48 }
0x104e   :  { %1151 = vmatpush.bf16.msra.mxu2 %v2013_v63 }
0x1052   :  { %1152 = vmatpush.bf16.msra.mxu2 %v2019_v0 }
0x1055   :  { %1445 = vmatmul.msk.bf16.vlgmr.msrb.gmra.mxu2 %vm763_vm8, %v889_v13 }
0x10c8   :  { %v678_v15 = vpop.f32.mrf.mxu2 }
0x10c9   :  { %v2105_v16 = vadd.f32 %v678_v15, %v241_v14 }
0x10d0   :  { %v680_v62 = vpop.f32.mrf.mxu2 }
0x10d8   :  { %v902_v17 = vpop.f32.mrf.mxu2 }
0x10d9   :  { %v903_v48 = vadd.f32 %v2044_v11, %v902_v17 }
0x10db   :  { %1591 = vtanh.f32 %v903_v48  ;;  %v1446_v0 = vmul.f32 -1.442695, %v903_v48 }
0x10dd   :  { %1593 = vpow2.f32 %v1446_v0 }
0x10e0   :  { %v904_v63 = vpop.f32.mrf.mxu2 }
0x10e1   :  { %v1592_v18 = vpop.eup %1591 }
0x10e2   :  { %928 = vrot.lane.b32.xlu0 %v1592_v18, %s1766_s13 }
0x10e3   :  { %v1594_v22 = vpop.eup %1593 }
0x10e4   :  { %v909_v24 = vadd.f32 1.0, %v1594_v22 }
0x10e6   :  { %1595 = vrcp.f32 %v909_v24  ;;  %v921_v27 = vand.u32 2147483648, %v909_v24  ;;  %vm915_vm12 = vweird.f32 %v909_v24  ;;  %v919_v28 = vand.u32 2147483647, %v909_v24 }
0x10e8   :  { %v922_v31 = vor.u32 1.1754944e-38, %v921_v27  ;;  %vm920_vm14 = vcmp.eq.f32.partialorder %v919_v28, 8.507059e+37 }
0x10ea   :  { %944 = vrot.lane.b32.xlu0 %v1984_v29, %s1774_s12 }
0x10ec   :  { %v1596_v20 = vpop.eup %1595 }
0x10ed   :  { %v911_v21 = vmul.f32 %v1596_v20, %v909_v24  ;;  %vm916_vm11 = vweird.f32 %v1596_v20 }
0x10ee   :  { %vm917_vm13 = vmor %vm915_vm12, %vm916_vm11 }
0x10ef   :  { %v912_v25 = vsub.f32 1.0, %v911_v21 }
0x10f1   :  { %v913_v26 = vmul.f32 %v1596_v20, %v912_v25 }
0x10f3   :  { %v914_v19 = vadd.f32 %v1596_v20, %v913_v26 }
0x10f5   :  { %v918_v30 = vsel %vm917_vm13, %v1596_v20, %v914_v19 }
0x10f6   :  { %v923_v29 = vsel %vm920_vm14, %v922_v31, %v918_v30 }
0x10f7   :  { %v926_v34 = vmul.f32 %v923_v29, %v873_v5 }
0x1154   :  { %v929_v32 = vpop.permute.xlu0 %928 }
0x1155   :  { %v931_v33 = vmul.f32 %v929_v32, %v923_v29 }
0x1157   :  { %933 = vrot.lane.b32.xlu1 %v931_v33, %s1774_s12 }
0x115c   :  { %v945_v40 = vpop.permute.xlu0 %944 }
0x11c9   :  { %v934_v35 = vpop.permute.xlu1 %933 }
0x11ca   :  { %v936_v36 = vadd.f32 %v934_v35, %v926_v34 }
0x11cc   :  { %1597 = vtanh.f32 %v936_v36 }
0x11d2   :  { %v1598_v37 = vpop.eup %1597 }
0x11d3   :  { %939 = vrot.lane.b32.xlu2 %v1598_v37, %s1766_s13 }
0x122d   :  { %v940_v38 = vpop.permute.xlu2 %939 }
0x122e   :  { %v942_v39 = vmul.f32 %v940_v38, %v923_v29 }
0x1230   :  { %948 = vrot.lane.b32.xlu1 %v942_v39, %s1766_s13 }
0x12a2   :  { %v949_v41 = vpop.permute.xlu1 %948 }
0x12a3   :  { %v951_v42 = vsel %vm259_vm6, %v945_v40, %v949_v41 }
0x12a4   :  { %v952_v43 = vpack.c.bf16 %v951_v42, %v951_v42 }
0x12a6   :  { %1447 = vmatmul.msk.bf16.vlgmr.msrb.gmra.mxu3 %vm763_vm8, %v952_v43 }
0x1329   :  { %v965_v44 = vpop.f32.mrf.mxu3 }
0x132a   :  { %v966_v45 = vadd.f32 %v2044_v11, %v965_v44 }
0x132c   :  { %1599 = vtanh.f32 %v966_v45  ;;  %v1448_v49 = vmul.f32 -1.442695, %v966_v45 }
0x132e   :  { %1601 = vpow2.f32 %v1448_v49 }
0x1331   :  { %v967_v46 = vpop.f32.mrf.mxu3 }
0x1332   :  { %v1600_v47 = vpop.eup %1599 }
0x1333   :  { %991 = vrot.lane.b32.xlu2 %v1600_v47, %s1766_s13 }
0x1334   :  { %v1602_v50 = vpop.eup %1601 }
0x1335   :  { %v972_v51 = vadd.f32 1.0, %v1602_v50 }
0x1337   :  { %1603 = vrcp.f32 %v972_v51  ;;  %v984_v57 = vand.u32 2147483648, %v972_v51  ;;  %vm978_vm2 = vweird.f32 %v972_v51  ;;  %v982_v3 = vand.u32 2147483647, %v972_v51 }
0x1339   :  { %v985_v5 = vor.u32 1.1754944e-38, %v984_v57  ;;  %vm983_vm4 = vcmp.eq.f32.partialorder %v982_v3, 8.507059e+37 }
0x133b   :  { %1007 = vrot.lane.b32.xlu2 %v1999_v60, %s1774_s12 }
0x133d   :  { %v1604_v52 = vpop.eup %1603 }
0x133e   :  { %v974_v54 = vmul.f32 %v1604_v52, %v972_v51  ;;  %vm979_vm15 = vweird.f32 %v1604_v52 }
0x133f   :  { %vm980_vm3 = vmor %vm978_vm2, %vm979_vm15 }
0x1340   :  { %v975_v56 = vsub.f32 1.0, %v974_v54 }
0x1342   :  { %v976_v58 = vmul.f32 %v1604_v52, %v975_v56 }
0x1344   :  { %v977_v59 = vadd.f32 %v1604_v52, %v976_v58 }
0x1346   :  { %v981_v4 = vsel %vm980_vm3, %v1604_v52, %v977_v59 }
0x1347   :  { %v986_v60 = vsel %vm983_vm4, %v985_v5, %v981_v4 }
0x1348   :  { %v989_v7 = vmul.f32 %v986_v60, %v936_v36 }
0x138d   :  { %v992_v23 = vpop.permute.xlu2 %991 }
0x138e   :  { %v994_v55 = vmul.f32 %v992_v23, %v986_v60 }
0x1390   :  { %996 = vrot.lane.b32.xlu0 %v994_v55, %s1774_s12 }
0x1395   :  { %v1008_v12 = vpop.permute.xlu2 %1007 }
0x1402   :  { %v997_v8 = vpop.permute.xlu0 %996 }
0x1403   :  { %v999_v9 = vadd.f32 %v997_v8, %v989_v7 }
0x1405   :  { %1605 = vtanh.f32 %v999_v9 }
0x140b   :  { %v1606_v53 = vpop.eup %1605 }
0x140c   :  { %1002 = vrot.lane.b32.xlu1 %v1606_v53, %s1766_s13 }
0x147e   :  { %v1003_v61 = vpop.permute.xlu1 %1002 }
0x147f   :  { %v1005_v10 = vmul.f32 %v1003_v61, %v986_v60 }
0x1481   :  { %1011 = vrot.lane.b32.xlu0 %v1005_v10, %s1766_s13 }
0x14f3   :  { %v1012_v13 = vpop.permute.xlu0 %1011 }
0x14f4   :  { %v1014_v14 = vsel %vm259_vm6, %v1008_v12, %v1012_v13 }
0x14f5   :  { %v1015_v15 = vpack.c.bf16 %v1014_v14, %v1014_v14 }
0x14f7   :  { %1449 = vmatmul.msk.bf16.vlgmr.msrb.gmra.mxu0 %vm763_vm8, %v1015_v15 }
0x1574   :  { %v1028_v62 = vpop.f32.mrf.mxu0 }
0x1575   :  { %v1029_v17 = vadd.f32 %v2044_v11, %v1028_v62 }
0x1577   :  { %1607 = vtanh.f32 %v1029_v17  ;;  %v1450_v18 = vmul.f32 -1.442695, %v1029_v17 }
0x1579   :  { %1609 = vpow2.f32 %v1450_v18 }
0x157c   :  { %v1030_v48 = vpop.f32.mrf.mxu0 }
0x157d   :  { %v1608_v63 = vpop.eup %1607 }
0x157e   :  { %1054 = vrot.lane.b32.xlu1 %v1608_v63, %s1766_s13 }
0x157f   :  { %v1610_v0 = vpop.eup %1609 }
0x1580   :  { %v1035_v22 = vadd.f32 1.0, %v1610_v0 }
0x1582   :  { %1611 = vrcp.f32 %v1035_v22  ;;  %v1047_v19 = vand.u32 2147483648, %v1035_v22  ;;  %vm1041_vm1 = vweird.f32 %v1035_v22  ;;  %v1045_v27 = vand.u32 2147483647, %v1035_v22 }
0x1584   :  { %v1048_v30 = vor.u32 1.1754944e-38, %v1047_v19  ;;  %vm1046_vm7 = vcmp.eq.f32.partialorder %v1045_v27, 8.507059e+37 }
0x1586   :  { %1070 = vrot.lane.b32.xlu1 %v2061_v2, %s1774_s12 }
0x1588   :  { %v1612_v24 = vpop.eup %1611 }
0x1589   :  { %v1037_v20 = vmul.f32 %v1612_v24, %v1035_v22  ;;  %vm1042_vm0 = vweird.f32 %v1612_v24 }
0x158a   :  { %vm1043_vm5 = vmor %vm1041_vm1, %vm1042_vm0 }
0x158b   :  { %v1038_v21 = vsub.f32 1.0, %v1037_v20 }
0x158d   :  { %v1039_v25 = vmul.f32 %v1612_v24, %v1038_v21 }
0x158f   :  { %v1040_v26 = vadd.f32 %v1612_v24, %v1039_v25 }
0x1591   :  { %v1044_v28 = vsel %vm1043_vm5, %v1612_v24, %v1040_v26 }
0x1592   :  { %v1049_v2 = vsel %vm1046_vm7, %v1048_v30, %v1044_v28 }
0x1593   :  { %v1052_v29 = vmul.f32 %v1049_v2, %v999_v9  ;;  %v1423_v9 = vmul.f32 -1.442695, %v2105_v16 }
0x15f0   :  { %v1055_v31 = vpop.permute.xlu1 %1054 }
0x15f1   :  { %v1057_v32 = vmul.f32 %v1055_v31, %v1049_v2 }
0x15f3   :  { %1059 = vrot.lane.b32.xlu2 %v1057_v32, %s1774_s12 }
0x15f8   :  { %v1071_v38 = vpop.permute.xlu1 %1070 }
0x164d   :  { %v1060_v33 = vpop.permute.xlu2 %1059 }
0x164e   :  { %v1062_v34 = vadd.f32 %v1060_v33, %v1052_v29 }
0x1650   :  { %1613 = vtanh.f32 %v1062_v34 }
0x1656   :  { %v1614_v35 = vpop.eup %1613 }
0x1657   :  { %1065 = vrot.lane.b32.xlu0 %v1614_v35, %s1766_s13 }
0x16c9   :  { %v1066_v36 = vpop.permute.xlu0 %1065 }
0x16ca   :  { %v1068_v37 = vmul.f32 %v1066_v36, %v1049_v2 }
0x16cc   :  { %1074 = vrot.lane.b32.xlu2 %v1068_v37, %s1766_s13 }
0x1726   :  { %v1075_v39 = vpop.permute.xlu2 %1074 }
0x1727   :  { %v1077_v40 = vsel %vm259_vm6, %v1071_v38, %v1075_v39 }
0x1728   :  { %v1078_v41 = vpack.c.bf16 %v1077_v40, %v1077_v40 }
0x172a   :  { %1451 = vmatmul.msk.bf16.vlgmr.msrb.gmra.mxu1 %vm763_vm8, %v1078_v41 }
0x17a7   :  { %v1091_v42 = vpop.f32.mrf.mxu1 }
0x17a8   :  { %v1092_v43 = vadd.f32 %v2044_v11, %v1091_v42 }
0x17aa   :  { %1615 = vtanh.f32 %v1092_v43  ;;  %v1452_v46 = vmul.f32 -1.442695, %v1092_v43 }
0x17ac   :  { %1617 = vpow2.f32 %v1452_v46 }
0x17af   :  { %v1093_v44 = vpop.f32.mrf.mxu1 }
0x17b0   :  { %v1616_v45 = vpop.eup %1615 }
0x17b1   :  { %1117 = vrot.lane.b32.xlu0 %v1616_v45, %s1766_s13 }
0x17b2   :  { %v1618_v47 = vpop.eup %1617 }
0x17b3   :  { %v1098_v49 = vadd.f32 1.0, %v1618_v47 }
0x17b5   :  { %1619 = vrcp.f32 %v1098_v49  ;;  %v1110_v58 = vand.u32 2147483648, %v1098_v49  ;;  %vm1104_vm10 = vweird.f32 %v1098_v49  ;;  %v1108_v59 = vand.u32 2147483647, %v1098_v49 }
0x17b7   :  { %v1111_v3 = vor.u32 1.1754944e-38, %v1110_v58  ;;  %vm1109_vm12 = vcmp.eq.f32.partialorder %v1108_v59, 8.507059e+37 }
0x17b9   :  { %1133 = vrot.lane.b32.xlu0 %v2090_v6, %s1774_s12 }
0x17bb   :  { %v1620_v50 = vpop.eup %1619 }
0x17bc   :  { %v1100_v51 = vmul.f32 %v1620_v50, %v1098_v49  ;;  %vm1105_vm9 = vweird.f32 %v1620_v50 }
0x17bd   :  { %vm1106_vm11 = vmor %vm1104_vm10, %vm1105_vm9 }
0x17be   :  { %v1101_v52 = vsub.f32 1.0, %v1100_v51 }
0x17c0   :  { %v1102_v54 = vmul.f32 %v1620_v50, %v1101_v52 }
0x17c2   :  { %v1103_v56 = vadd.f32 %v1620_v50, %v1102_v54 }
0x17c4   :  { %v1107_v57 = vsel %vm1106_vm11, %v1620_v50, %v1103_v56  ;;  %vm1268_vm11 = vcmask 785408  }
0x17c5   :  { %v1112_v6 = vsel %vm1109_vm12, %v1111_v3, %v1107_v57 }
0x17c6   :  { %v1115_v23 = vmul.f32 %v1112_v6, %v1062_v34 }
0x1823   :  { %v1118_v4 = vpop.permute.xlu0 %1117 }
0x1824   :  { %v1120_v5 = vmul.f32 %v1118_v4, %v1112_v6 }
0x1826   :  { %1122 = vrot.lane.b32.xlu1 %v1120_v5, %s1774_s12 }
0x182b   :  { %v1134_v20 = vpop.permute.xlu0 %1133 }
0x1898   :  { %v1123_v60 = vpop.permute.xlu1 %1122 }
0x1899   :  { %v2139_v55 = vadd.f32 %v1123_v60, %v1115_v23 }
0x189b   :  { %1621 = vtanh.f32 %v2139_v55 }
0x189c   :  { %1623 = vtanh.f32 %v2105_v16 }
0x189d   :  { %1625 = vpow2.f32 %v1423_v9 }
0x18a1   :  { %v1622_v7 = vpop.eup %1621 }
0x18a2   :  { %1128 = vrot.lane.b32.xlu2 %v1622_v7, %s1766_s13  ;;  %v1624_v8 = vpop.eup %1623 }
0x18a3   :  { %v1626_v53 = vpop.eup %1625 }
0x18a4   :  { %v686_v61 = vadd.f32 1.0, %v1626_v53 }
0x18a6   :  { %1627 = vrcp.f32 %v686_v61  ;;  %v698_v48 = vand.u32 2147483648, %v686_v61  ;;  %vm692_vm14 = vweird.f32 %v686_v61  ;;  %v696_v63 = vand.u32 2147483647, %v686_v61 }
0x18a8   :  { %v699_v16 = vor.u32 1.1754944e-38, %v698_v48  ;;  %vm697_vm2 = vcmp.eq.f32.partialorder %v696_v63, 8.507059e+37 }
0x18aa   :  { %705 = vrot.lane.b32.xlu2 %v1624_v8, %s1766_s13 }
0x18ac   :  { %v1628_v10 = vpop.eup %1627 }
0x18ad   :  { %v688_v12 = vmul.f32 %v1628_v10, %v686_v61  ;;  %vm693_vm13 = vweird.f32 %v1628_v10 }
0x18ae   :  { %vm694_vm15 = vmor %vm692_vm14, %vm693_vm13 }
0x18af   :  { %v689_v13 = vsub.f32 1.0, %v688_v12 }
0x18b1   :  { %v690_v14 = vmul.f32 %v1628_v10, %v689_v13 }
0x18b3   :  { %v691_v17 = vadd.f32 %v1628_v10, %v690_v14 }
0x18b5   :  { %v695_v18 = vsel %vm694_vm15, %v1628_v10, %v691_v17 }
0x18b6   :  { %v700_v0 = vsel %vm697_vm2, %v699_v16, %v695_v18 }
0x18b7   :  { %v703_v30 = vmul.f32 %v700_v0, %v2082_v1 }
0x18fc   :  { %v1129_v15 = vpop.permute.xlu2 %1128 }
0x18fd   :  { %v1131_v62 = vmul.f32 %v1129_v15, %v1112_v6 }
0x18ff   :  { %1137 = vrot.lane.b32.xlu1 %v1131_v62, %s1766_s13 }
0x1904   :  { %v706_v22 = vpop.permute.xlu2 %705 }
0x1905   :  { %v708_v24 = vmul.f32 %v706_v22, %v700_v0  ;;  %v1503_v22 = vld [vmem:[%s2205_s6 + $0x38] sm:$0xff] }
0x1906   :  { %1340 = vmatpush.bf16.msra.mxu0 %v1503_v22 }
0x1907   :  { %710 = vrot.lane.b32.xlu1 %v708_v24, %s1774_s12  ;;  %v1502_v24 = vld [vmem:[%s2205_s6 + $0x30] sm:$0xff] }
0x190a   :  { %1341 = vmatpush.bf16.msra.mxu0 %v1502_v24 }
0x1971   :  { %v1138_v21 = vpop.permute.xlu1 %1137 }
0x1972   :  { %v1140_v25 = vsel %vm259_vm6, %v1134_v20, %v1138_v21  ;;  %v1501_v20 = vld [vmem:[%s2205_s6 + $0x28] sm:$0xff]  ;;  %v1500_v21 = vld [vmem:[%s2205_s6 + $0x20] sm:$0xff] }
0x1973   :  { %v1141_v26 = vpack.c.bf16 %v1140_v25, %v1140_v25  ;;  %1342 = vmatpush.bf16.msra.mxu0 %v1501_v20  ;;  %v1499_v25 = vld [vmem:[%s2205_s6 + $0x18] sm:$0xff] }
0x1975   :  { %1453 = vmatmul.msk.bf16.vlgmr.msra.gmra.mxu2 %vm763_vm8, %v1141_v26 }
0x1977   :  { %1343 = vmatpush.bf16.msra.mxu0 %v1500_v21 }
0x1979   :  { %v711_v28 = vpop.permute.xlu1 %710 }
0x197a   :  { %v2152_v31 = vadd.f32 %v711_v28, %v703_v30  ;;  %v1497_v28 = vld [vmem:[%s2205_s6 + $0x8] sm:$0xff]  ;;  %v1496_v30 = vld [vmem:[%s2205_s6] sm:$0xff] }
0x197b   :  { %1344 = vmatpush.bf16.msra.mxu0 %v1499_v25 }
0x19f8   :  { %v1154_v19 = vpop.f32.mrf.mxu2 }
0x19f9   :  { %v1155_v27 = vadd.f32 %v2044_v11, %v1154_v19 }
0x19fb   :  { %1629 = vtanh.f32 %v1155_v27  ;;  %v1454_v33 = vmul.f32 -1.442695, %v1155_v27  ;;  %v1498_v27 = vld [vmem:[%s2205_s6 + $0x10] sm:$0xff] }
0x19fc   :  { %1631 = vtanh.f32 %v2152_v31  ;;  %1345 = vmatpush.bf16.msra.mxu0 %v1498_v27 }
0x19fd   :  { %1633 = vpow2.f32 %v1454_v33 }
0x1a00   :  { %v1156_v2 = vpop.f32.mrf.mxu2  ;;  %1346 = vmatpush.bf16.msra.mxu0 %v1497_v28 }
0x1a01   :  { %v1630_v32 = vpop.eup %1629 }
0x1a02   :  { %1180 = vrot.lane.b32.xlu0 %v1630_v32, %s1766_s13  ;;  %v1632_v29 = vpop.eup %1631 }
0x1a03   :  { %v1634_v34 = vpop.eup %1633 }
0x1a04   :  { %v1161_v35 = vadd.f32 1.0, %v1634_v34  ;;  %1347 = vmatpush.bf16.msra.mxu0 %v1496_v30 }
0x1a06   :  { %1635 = vrcp.f32 %v1161_v35  ;;  %v1173_v40 = vand.u32 2147483648, %v1161_v35  ;;  %vm1167_vm4 = vweird.f32 %v1161_v35  ;;  %v1171_v41 = vand.u32 2147483647, %v1161_v35 }
0x1a08   :  { %v1174_v43 = vor.u32 1.1754944e-38, %v1173_v40  ;;  %vm1172_vm1 = vcmp.eq.f32.partialorder %v1171_v41, 8.507059e+37 }
0x1a0a   :  { %716 = vrot.lane.b32.xlu0 %v1632_v29, %s1766_s13 }
0x1a0c   :  { %v1636_v36 = vpop.eup %1635 }
0x1a0d   :  { %v1163_v37 = vmul.f32 %v1636_v36, %v1161_v35  ;;  %vm1168_vm3 = vweird.f32 %v1636_v36 }
0x1a0e   :  { %vm1169_vm0 = vmor %vm1167_vm4, %vm1168_vm3 }
0x1a0f   :  { %v1164_v38 = vsub.f32 1.0, %v1163_v37  ;;  %v1518_v37 = vld [vmem:[#allocation10] ss:$0 sm:$0xff] }
0x1a11   :  { %v1165_v1 = vmul.f32 %v1636_v36, %v1164_v38 }
0x1a13   :  { %v1166_v39 = vadd.f32 %v1636_v36, %v1165_v1 }
0x1a15   :  { %v1170_v42 = vsel %vm1169_vm0, %v1636_v36, %v1166_v39 }
0x1a16   :  { %v1175_v45 = vsel %vm1172_vm1, %v1174_v43, %v1170_v42 }
0x1a17   :  { %v1178_v50 = vmul.f32 %v1175_v45, %v2139_v55 }
0x1a74   :  { %v1181_v44 = vpop.permute.xlu0 %1180 }
0x1a75   :  { %v1183_v46 = vmul.f32 %v1181_v44, %v1175_v45 }
0x1a77   :  { %1185 = vrot.lane.b32.xlu2 %v1183_v46, %s1774_s12 }
0x1a7c   :  { %v717_v47 = vpop.permute.xlu0 %716 }
0x1a7d   :  { %v719_v49 = vmul.f32 %v717_v47, %v700_v0 }
0x1a7f   :  { %1196 = vrot.lane.b32.xlu2 %v719_v49, %s1774_s12 }
0x1ad1   :  { %v1186_v51 = vpop.permute.xlu2 %1185 }
0x1ad2   :  { %v1188_v52 = vadd.f32 %v1186_v51, %v1178_v50 }
0x1ad4   :  { %1637 = vtanh.f32 %v1188_v52 }
0x1ad9   :  { %v1197_v59 = vpop.permute.xlu2 %1196 }
0x1ada   :  { %v1638_v54 = vpop.eup %1637  ;;  %v1266_v2 = vsel %vm259_vm6, %v1197_v59, %v2152_v31 }
0x1adb   :  { %1191 = vrot.lane.b32.xlu1 %v1638_v54, %s1766_s13 }
0x1b4d   :  { %v1192_v56 = vpop.permute.xlu1 %1191 }
0x1b4e   :  { %v1194_v58 = vmul.f32 %v1192_v56, %v1175_v45 }
0x1b50   :  { %1200 = vrot.lane.b32.xlu0 %v1194_v58, %s1766_s13 }
0x1bc2   :  { %v1201_v57 = vpop.permute.xlu0 %1200 }
0x1bc3   :  { %v1203_v3 = vsel %vm259_vm6, %v1197_v59, %v1201_v57 }
0x1bc4   :  { %v1204_v4 = vpack.c.bf16 %v1203_v3, %v1203_v3 }
0x1bc6   :  { %1455 = vmatmul.msk.bf16.vlgmr.msra.gmra.mxu3 %vm763_vm8, %v1204_v4 }
0x1c49   :  { %v1217_v6 = vpop.f32.mrf.mxu3 }
0x1c4a   :  { %v1218_v5 = vadd.f32 %v2044_v11, %v1217_v6 }
0x1c4c   :  { %1639 = vtanh.f32 %v1218_v5  ;;  %v1456_v55 = vmul.f32 -1.442695, %v1218_v5 }
0x1c4e   :  { %1641 = vpow2.f32 %v1456_v55 }
0x1c51   :  { %v1219_v23 = vpop.f32.mrf.mxu3 }
0x1c52   :  { %v1640_v60 = vpop.eup %1639 }
0x1c53   :  { %1243 = vrot.lane.b32.xlu1 %v1640_v60, %s1766_s13 }
0x1c54   :  { %v1642_v7 = vpop.eup %1641 }
0x1c55   :  { %v1224_v8 = vadd.f32 1.0, %v1642_v7 }
0x1c57   :  { %1643 = vrcp.f32 %v1224_v8  ;;  %v1236_v13 = vand.u32 2147483648, %v1224_v8  ;;  %vm1230_vm7 = vweird.f32 %v1224_v8  ;;  %v1234_v14 = vand.u32 2147483647, %v1224_v8 }
0x1c59   :  { %v1237_v15 = vor.u32 1.1754944e-38, %v1236_v13  ;;  %vm1235_vm10 = vcmp.eq.f32.partialorder %v1234_v14, 8.507059e+37 }
0x1c5d   :  { %v1644_v9 = vpop.eup %1643 }
0x1c5e   :  { %v1226_v53 = vmul.f32 %v1644_v9, %v1224_v8  ;;  %vm1231_vm5 = vweird.f32 %v1644_v9 }
0x1c5f   :  { %vm1232_vm9 = vmor %vm1230_vm7, %vm1231_vm5 }
0x1c60   :  { %v1227_v61 = vsub.f32 1.0, %v1226_v53 }
0x1c62   :  { %v1228_v10 = vmul.f32 %v1644_v9, %v1227_v61 }
0x1c64   :  { %v1229_v12 = vadd.f32 %v1644_v9, %v1228_v10 }
0x1c66   :  { %v1233_v11 = vsel %vm1232_vm9, %v1644_v9, %v1229_v12 }
0x1c67   :  { %v1238_v17 = vsel %vm1235_vm10, %v1237_v15, %v1233_v11 }
0x1c68   :  { %v1241_v63 = vmul.f32 %v1238_v17, %v1188_v52 }
0x1cc5   :  { %v1244_v62 = vpop.permute.xlu1 %1243 }
0x1cc6   :  { %v1246_v48 = vmul.f32 %v1244_v62, %v1238_v17 }
0x1cc8   :  { %1248 = vrot.lane.b32.xlu2 %v1246_v48, %s1774_s12 }
0x1d22   :  { %v1249_v18 = vpop.permute.xlu2 %1248 }
0x1d23   :  { %v1251_v16 = vadd.f32 %v1249_v18, %v1241_v63 }
0x1d25   :  { %1645 = vtanh.f32 %v1251_v16  ;;  %1263 = vrot.lane.b32.xlu2 %v1251_v16, %s1766_s13 }
0x1d2b   :  { %v1646_v0 = vpop.eup %1645 }
0x1d2c   :  { %1254 = vrot.lane.b32.xlu0 %v1646_v0, %s1766_s13 }
0x1d7f   :  { %v1264_v29 = vpop.permute.xlu2 %1263 }
0x1d9e   :  { %v1255_v26 = vpop.permute.xlu0 %1254 }
0x1d9f   :  { %v1257_v19 = vmul.f32 %v1255_v26, %v1238_v17 }
0x1da1   :  { %1259 = vrot.lane.b32.xlu1 %v1257_v19, %s1775_s2 }
0x1e13   :  { %v1260_v32 = vpop.permute.xlu1 %1259 }
0x1e14   :  { %v1267_v33 = vsel %vm763_vm8, %v1266_v2, %v1260_v32 }
0x1e15   :  { %v1269_v34 = vsel %vm1268_vm11, %v1267_v33, %v1264_v29 }
0x1e16   :  { %1647 = vtanh.f32 %v1269_v34 }
0x1e1c   :  { %v1648_v35 = vpop.eup %1647 }
0x1e1d   :  { %v1271_v36 = vpack.c.bf16 %v1648_v35, %v1648_v35 }
0x1e1f   :  { %1348 = vmatmul.bf16.vlgmr.msra.gmra.mxu0 %v1271_v36 }
0x1e9c   :  { %v1349_v38 = vpop.f32.mrf.mxu0 }
0x1e9d   :  { %v1350_v1 = vadd.f32 %v1518_v37, %v1349_v38 }
0x1e9f   :  { %1353 = vst [vmem:[%s2207_s8] sm:$0xff] %v1350_v1 }
0x1ea4   :  { %v1351_v39 = vpop.f32.mrf.mxu0 }
0x1ea5   :  { %1358 = vsyncpa [#allocation4], 1 }
0x1ea6   :  { %1359 = vsyncpa [#allocation8], 1 }
0x1ea7   :  { %1360 = vsyncpa [#allocation11], 1 }
0x1ea8   :  { %1361 = vsyncpa [#allocation5], 1 }

</bundles_post_ra>
